<compile_context>
chip_gen: v5e
topology: v5e:2x2
jax: 0.10.0
libtpu: 0.0.40
codegen_flags: <defaults>
</compile_context>

<pallas_src>
import functools

import jax
import jax.numpy as jnp
from jax.experimental import pallas as pl
from jax.experimental.pallas import tpu as pltpu


# ----------------------------------------------------------------------------
# helpers
# ----------------------------------------------------------------------------
def _round_up(x, m):
    return ((x + m - 1) // m) * m


def _apply_act(v, act):
    if act is None:
        return v
    if act == "leaky":
        return jnp.where(v >= 0, v, 0.2 * v)
    if act == "relu":
        return jnp.maximum(v, 0)
    if act == "tanh":
        return jnp.tanh(v)
    raise ValueError(act)


# ----------------------------------------------------------------------------
# Pallas kernel: 2x2 stride-1 VALID conv as 4 accumulated MXU GEMMs
# ----------------------------------------------------------------------------
def _conv2x2_kernel(x_ref, h_ref, w_ref, b_ref, o_ref, *, ws, pre_act, out_act):
    # x_ref : (1, mblk, K)  bf16  current row block of flattened (row*col, channels) input
    # h_ref : (1, 8*ws, K)  bf16  halo = first 8 spatial rows of the *next* block
    # w_ref : (4, K, tco)   bf16  tap index = 2*dy + dx
    # b_ref : (1, tco)      f32
    # o_ref : (1, mblk, tco) bf16/f32
    mblk = x_ref.shape[1]
    xa = jnp.concatenate([x_ref[0], h_ref[0]], axis=0)     # (mblk + 8*ws, K)
    xa = _apply_act(xa, pre_act)                            # fused pre-act (act(0)=0 -> pad-safe)

    acc = None
    for dy in range(2):                                     # static 2x2 tap loop -> 4 MXU GEMMs
        for dx in range(2):
            off = dy * ws + dx
            part = jnp.dot(xa[off:off + mblk, :], w_ref[2 * dy + dx],
                           preferred_element_type=jnp.float32)
            acc = part if acc is None else acc + part

    acc = acc + b_ref[...]                                  # f32 epilogue
    acc = _apply_act(acc, out_act)
    o_ref[...] = acc[None].astype(o_ref.dtype)


def _conv2x2_pallas(xs, w_taps, bias, *, pre_act, out_act, out_dtype):
    """2x2 stride-1 VALID conv, NHWC.

    xs: [N, Hs, Ws, K], w_taps: [4, K, Cout] (tap = 2*dy+dx), bias: [Cout].
    Returns [N, Hs-1, Ws-1, Cout] in `out_dtype`.
    """
    N, Hs, Ws, K = xs.shape
    Cout = w_taps.shape[-1]
    Ho, Wo = Hs - 1, Ws - 1

    # ---- tiling ----------------------------------------------------------
    cp = _round_up(Cout, 128)                 # lane-dense output channels
    tco = 256 if cp % 256 == 0 else 128       # output-channel tile
    th = max(1, min(-(-512 // Ws), Ho))       # target ~512 flattened rows per block
    th = _round_up(th, 16)                    # 8 | th (halo indexing) + bf16-friendly blocks
    n_t = -(-Ho // th)
    h_pad = (n_t + 1) * th                    # one extra block so the last halo exists
    mblk = th * Ws
    halo = 8 * Ws                             # 8 spatial rows >= the Ws+1 rows actually needed
    assert th % 8 == 0 and halo <= mblk

    xs_p = jnp.pad(xs, ((0, 0), (0, h_pad - Hs), (0, 0), (0, 0)))
    xf = xs_p.reshape(N, h_pad * Ws, K).astype(jnp.bfloat16)          # bf16 MXU operand
    wm = jnp.pad(w_taps, ((0, 0), (0, 0), (0, cp - Cout))).astype(jnp.bfloat16)
    bm = jnp.pad(bias, (0, cp - Cout)).astype(jnp.float32).reshape(1, cp)

    th8 = th // 8                             # halo block index stride (8 spatial rows / block)
    out = pl.pallas_call(
        functools.partial(_conv2x2_kernel, ws=Ws, pre_act=pre_act, out_act=out_act),
        out_shape=jax.ShapeDtypeStruct((N, n_t * mblk, cp), out_dtype),
        grid=(N, cp // tco, n_t),             # weight tile resident over the row-block loop
        in_specs=[
            pl.BlockSpec((1, mblk, K), lambda n, c, t: (n, t, 0)),              # current rows
            pl.BlockSpec((1, halo, K), lambda n, c, t: (n, (t + 1) * th8, 0)),  # 8-row halo
            pl.BlockSpec((4, K, tco), lambda n, c, t: (0, 0, c)),
            pl.BlockSpec((1, tco), lambda n, c, t: (0, c)),
        ],
        out_specs=pl.BlockSpec((1, mblk, tco), lambda n, c, t: (n, t, c)),
        compiler_params=pltpu.CompilerParams(
            dimension_semantics=("parallel", "parallel", "parallel"),
            vmem_limit_bytes=48 * 1024 * 1024,          # stays under v7x's 64 MiB VMEM
        ),
    )(xf, xf, wm, bm)

    y = out.reshape(N, n_t * th, Ws, cp)
    return y[:, :Ho, :Wo, :Cout]


# ----------------------------------------------------------------------------
# Conv2d(k=4, s=2, p=1)  and  ConvTranspose2d(k=4, s=2, p=1), NHWC
# ----------------------------------------------------------------------------
def conv4x4_s2_nhwc(x, w_oihw, bias, *, pre_act=None, out_act=None,
                    out_dtype=jnp.bfloat16):
    """PyTorch Conv2d(Cin, Cout, 4, stride=2, padding=1) via space-to-depth + 2x2 conv."""
    N, H, W, Cin = x.shape
    Cout = w_oihw.shape[0]
    assert H % 2 == 0 and W % 2 == 0
    xp = jnp.pad(x, ((0, 0), (1, 1), (1, 1), (0, 0)))
    Hs, Ws = (H + 2) // 2, (W + 2) // 2
    xs = xp.reshape(N, Hs, 2, Ws, 2, Cin)
    xs = xs.transpose(0, 1, 3, 2, 4, 5).reshape(N, Hs, Ws, 4 * Cin)   # channel = (py,px,ci)
    # weight: w[co, ci, 2dy+py, 2dx+px] -> Wtap[2dy+dx, (py,px,ci), co]
    wt = jnp.transpose(w_oihw, (2, 3, 1, 0))                 # (ky, kx, ci, co)
    wt = wt.reshape(2, 2, 2, 2, Cin, Cout)                   # (dy, py, dx, px, ci, co)
    wt = wt.transpose(0, 2, 1, 3, 4, 5).reshape(4, 4 * Cin, Cout)
    return _conv2x2_pallas(xs, wt, bias, pre_act=pre_act, out_act=out_act,
                           out_dtype=out_dtype)


def conv_transpose4x4_s2_nhwc(x, w_iohw, bias, *, pre_act=None, out_act=None,
                              out_dtype=jnp.bfloat16):
    """PyTorch ConvTranspose2d(Cin, Cout, 4, stride=2, padding=1): one 2x2 conv producing
    the 4 output parities as channel groups, then a depth-to-space interleave."""
    N, H, W, Cin = x.shape
    Cout = w_iohw.shape[1]
    xp = jnp.pad(x, ((0, 0), (1, 1), (1, 1), (0, 0)))
    # Wtap[dy,dx][ci, (a,b,co)] = w[ci, co, 3-a-2dy, 3-b-2dx]
    wf = w_iohw[:, :, ::-1, ::-1]                            # wf[ci,co,k,l] = w[ci,co,3-k,3-l]
    wf = wf.reshape(Cin, Cout, 2, 2, 2, 2)                   # (ci, co, dy, a, dx, b)
    wt = wf.transpose(2, 4, 0, 3, 5, 1).reshape(4, Cin, 4 * Cout)
    b4 = jnp.tile(bias, 4)
    c = _conv2x2_pallas(xp, wt, b4, pre_act=pre_act, out_act=out_act,
                        out_dtype=out_dtype)                 # [N, H+1, W+1, 4*Cout]
    c = c.reshape(N, H + 1, W + 1, 2, 2, Cout)
    p00 = c[:, 0:H, 0:W, 0, 0, :]
    p01 = c[:, 0:H, 1:W + 1, 0, 1, :]
    p10 = c[:, 1:H + 1, 0:W, 1, 0, :]
    p11 = c[:, 1:H + 1, 1:W + 1, 1, 1, :]
    y = jnp.stack([jnp.stack([p00, p01], axis=3),
                   jnp.stack([p10, p11], axis=3)], axis=2)   # [N, H, 2, W, 2, Cout]
    return y.reshape(N, 2 * H, 2 * W, Cout)


def batchnorm2d_nhwc(x, gamma, beta, eps=1e-5):
    # PyTorch BatchNorm2d training-mode semantics: biased batch stats over (N, H, W).
    xf = x.astype(jnp.float32)
    mean = jnp.mean(xf, axis=(0, 1, 2), keepdims=True)
    var = jnp.mean(jnp.square(xf - mean), axis=(0, 1, 2), keepdims=True)
    y = (xf - mean) * jax.lax.rsqrt(var + eps) * gamma + beta
    return y.astype(x.dtype)


# ----------------------------------------------------------------------------
# UnetSkipConnectionBlock parameters + forward (norm_layer = BatchNorm2d)
# ----------------------------------------------------------------------------
def _uniform_init(key, fan_in, shape):
    bound = 1.0 / (fan_in ** 0.5)
    return jax.random.uniform(key, shape, jnp.float32, -bound, bound)


def build_unet_block(key, outer_nc, inner_nc, input_nc=None, submodule=None,
                     outermost=False, innermost=False):
    if input_nc is None:
        input_nc = outer_nc
    use_bias = False                      # norm_layer == nn.BatchNorm2d
    k_dw, k_db, k_uw, k_ub = jax.random.split(key, 4)
    cin_up = inner_nc if innermost else inner_nc * 2
    up_bias = True if outermost else use_bias
    p = {
        "outermost": outermost,
        "innermost": innermost,
        "submodule": submodule,
        # Conv2d(input_nc, inner_nc, 4, 2, 1, bias=use_bias): weight OIHW
        "w_down": _uniform_init(k_dw, input_nc * 16, (inner_nc, input_nc, 4, 4)),
        "b_down": (_uniform_init(k_db, input_nc * 16, (inner_nc,))
                   if use_bias else jnp.zeros((inner_nc,), jnp.float32)),
        # ConvTranspose2d(cin_up, outer_nc, 4, 2, 1): weight [Cin, Cout, kh, kw]
        "w_up": _uniform_init(k_uw, cin_up * 16, (cin_up, outer_nc, 4, 4)),
        "b_up": (_uniform_init(k_ub, cin_up * 16, (outer_nc,))
                 if up_bias else jnp.zeros((outer_nc,), jnp.float32)),
    }
    if (not outermost) and (not innermost):
        p["bn_down"] = (jnp.ones((inner_nc,), jnp.float32),
                        jnp.zeros((inner_nc,), jnp.float32))
    if not outermost:
        p["bn_up"] = (jnp.ones((outer_nc,), jnp.float32),
                      jnp.zeros((outer_nc,), jnp.float32))
    return p


def unet_block_forward_nhwc(p, x):
    outermost, innermost = p["outermost"], p["innermost"]
    # down path: [LeakyReLU(0.2)] -> Conv -> [BN]   (pre-activation fused in kernel)
    d = conv4x4_s2_nhwc(x, p["w_down"], p["b_down"],
                        pre_act=None if outermost else "leaky")
    if (not outermost) and (not innermost):
        d = batchnorm2d_nhwc(d, *p["bn_down"])
    mid = d if innermost else unet_block_forward_nhwc(p["submodule"], d)
    # up path: ReLU -> ConvT -> (Tanh | BN)   (ReLU / Tanh fused in kernel)
    u = conv_transpose4x4_s2_nhwc(
        mid, p["w_up"], p["b_up"], pre_act="relu",
        out_act="tanh" if outermost else None,
        out_dtype=jnp.float32 if outermost else jnp.bfloat16)
    if outermost:
        return u
    u = batchnorm2d_nhwc(u, *p["bn_up"])
    return jnp.concatenate([x, u], axis=-1)          # skip connection


def unet_forward(params, x_nchw):
    x = jnp.transpose(x_nchw, (0, 2, 3, 1)).astype(jnp.bfloat16)   # NCHW -> NHWC, bf16 flow
    y = unet_block_forward_nhwc(params, x)
    return jnp.transpose(y, (0, 3, 1, 2)).astype(jnp.float32)      # NHWC -> NCHW


# ----------------------------------------------------------------------------
# Pure-JAX references (lax convs, same bf16 casting) for numerical validation
# ----------------------------------------------------------------------------
def ref_conv4x4_s2_nhwc(x, w_oihw, bias):
    w = jnp.transpose(w_oihw, (2, 3, 1, 0)).astype(jnp.bfloat16)   # HWIO
    y = jax.lax.conv_general_dilated(
        x.astype(jnp.bfloat16), w, window_strides=(2, 2), padding=((1, 1), (1, 1)),
        dimension_numbers=("NHWC", "HWIO", "NHWC"),
        preferred_element_type=jnp.float32)
    return y + bias


def ref_convT4x4_s2_nhwc(x, w_iohw, bias):
    w = jnp.transpose(w_iohw[:, :, ::-1, ::-1], (2, 3, 0, 1)).astype(jnp.bfloat16)
    y = jax.lax.conv_general_dilated(
        x.astype(jnp.bfloat16), w, window_strides=(1, 1), padding=((2, 2), (2, 2)),
        lhs_dilation=(2, 2), dimension_numbers=("NHWC", "HWIO", "NHWC"),
        preferred_element_type=jnp.float32)
    return y + bias


def unet_block_forward_ref(p, x):
    outermost, innermost = p["outermost"], p["innermost"]
    xin = x if outermost else _apply_act(x, "leaky")
    d = ref_conv4x4_s2_nhwc(xin, p["w_down"], p["b_down"]).astype(jnp.bfloat16)
    if (not outermost) and (not innermost):
        d = batchnorm2d_nhwc(d, *p["bn_down"])
    mid = d if innermost else unet_block_forward_ref(p["submodule"], d)
    u = ref_convT4x4_s2_nhwc(_apply_act(mid, "relu"), p["w_up"], p["b_up"])
    if outermost:
        return jnp.tanh(u)
    u = batchnorm2d_nhwc(u.astype(jnp.bfloat16), *p["bn_up"])
    return jnp.concatenate([x, u], axis=-1)


def unet_forward_ref(params, x_nchw):
    x = jnp.transpose(x_nchw, (0, 2, 3, 1)).astype(jnp.bfloat16)
    y = unet_block_forward_ref(params, x)
    return jnp.transpose(y, (0, 3, 1, 2)).astype(jnp.float32)


# ----------------------------------------------------------------------------
if __name__ == "__main__":
    key = jax.random.PRNGKey(0)
    k_params, k_x, k_chk = jax.random.split(key, 3)

    # --- primitive numerical checks vs lax references (same bf16 casting) ----
    kc = jax.random.split(k_chk, 9)
    # down conv, multi-row-block path exercised (Ho=40 > th)
    xc = jax.random.normal(kc[0], (2, 80, 80, 6), jnp.float32)
    wc = jax.random.normal(kc[1], (10, 6, 4, 4), jnp.float32) * 0.1
    bc = jax.random.normal(kc[2], (10,), jnp.float32) * 0.1
    got = conv4x4_s2_nhwc(xc, wc, bc, out_dtype=jnp.float32)
    want = ref_conv4x4_s2_nhwc(xc, wc, bc)
    err = float(jnp.max(jnp.abs(got - want)))
    assert got.shape == want.shape and err < 1e-2, ("conv", got.shape, want.shape, err)

    # conv transpose, odd spatial, single block
    xt = jax.random.normal(kc[3], (2, 7, 5, 6), jnp.float32)
    wt = jax.random.normal(kc[4], (6, 9, 4, 4), jnp.float32) * 0.1
    bt = jax.random.normal(kc[5], (9,), jnp.float32) * 0.1
    got = conv_transpose4x4_s2_nhwc(xt, wt, bt, out_dtype=jnp.float32)
    want = ref_convT4x4_s2_nhwc(xt, wt, bt)
    err = float(jnp.max(jnp.abs(got - want)))
    assert got.shape == want.shape and err < 1e-2, ("convT", got.shape, want.shape, err)

    # conv transpose, multi-row-block path exercised
    xt2 = jax.random.normal(kc[6], (1, 40, 40, 6), jnp.float32)
    wt2 = jax.random.normal(kc[7], (6, 9, 4, 4), jnp.float32) * 0.1
    bt2 = jax.random.normal(kc[8], (9,), jnp.float32) * 0.1
    got = conv_transpose4x4_s2_nhwc(xt2, wt2, bt2, out_dtype=jnp.float32)
    want = ref_convT4x4_s2_nhwc(xt2, wt2, bt2)
    err = float(jnp.max(jnp.abs(got - want)))
    assert got.shape == want.shape and err < 1e-2, ("convT2", got.shape, want.shape, err)

    # --- 3-level U-Net: outermost(middle(innermost)) on a 16x16, 4-channel input ----
    k1, k2, k3 = jax.random.split(k_params, 3)
    inner = build_unet_block(k3, outer_nc=16, inner_nc=32, innermost=True)
    middle = build_unet_block(k2, outer_nc=8, inner_nc=16, submodule=inner)
    outer = build_unet_block(k1, outer_nc=3, inner_nc=8, input_nc=4,
                             submodule=middle, outermost=True)

    x = jax.random.normal(k_x, (2, 4, 16, 16), jnp.float32)

    fwd = jax.jit(lambda inp: unet_forward(outer, inp))
    out = jax.block_until_ready(fwd(x))

    assert out.shape == (2, 3, 16, 16), out.shape
    assert bool(jnp.all(jnp.isfinite(out)))

    ref = unet_forward_ref(outer, x)
    err = float(jnp.max(jnp.abs(out - ref)))
    assert err < 5e-2, ("forward mismatch", err)   # bf16 activation tolerance

    print("KERNEL_OK")
</pallas_src>

<mosaic_0001>
module attributes {stable_mosaic.version = 11 : i64} {
  func.func @_conv2x2_kernel(%arg0: i32, %arg1: i32, %arg2: i32, %arg3: memref<1x656x24xbf16, #tpu.memory_space<vmem>>, %arg4: memref<1x328x24xbf16, #tpu.memory_space<vmem>>, %arg5: memref<4x24x128xbf16, #tpu.memory_space<vmem>>, %arg6: memref<1x128xf32, #tpu.memory_space<vmem>>, %arg7: memref<1x656x128xf32, #tpu.memory_space<vmem>>) attributes {dimension_semantics = [#tpu.dimension_semantics<parallel>, #tpu.dimension_semantics<parallel>, #tpu.dimension_semantics<parallel>], iteration_bounds = array<i64: 2, 1, 3>, scalar_prefetch = 0 : i64, scratch_operands = 0 : i64, tpu.core_type = #tpu.core_type<tc>, window_params = [{transform_indices = @transform_0, window_bounds = array<i64: 1, 656, 24>}, {transform_indices = @transform_1, window_bounds = array<i64: 1, 328, 24>}, {transform_indices = @transform_2, window_bounds = array<i64: 4, 24, 128>}, {transform_indices = @transform_3, window_bounds = array<i64: 1, 128>}, {transform_indices = @transform_4, window_bounds = array<i64: 1, 656, 128>}]} {
    %c0 = arith.constant 0 : index
    %c0_0 = arith.constant 0 : index
    %c0_1 = arith.constant 0 : index
    %0 = vector.load %arg3[%c0, %c0_0, %c0_1] : memref<1x656x24xbf16, #tpu.memory_space<vmem>>, vector<1x656x24xbf16>
    %1 = vector.shape_cast %0 : vector<1x656x24xbf16> to vector<656x24xbf16>
    %c0_2 = arith.constant 0 : index
    %c0_3 = arith.constant 0 : index
    %c0_4 = arith.constant 0 : index
    %2 = vector.load %arg4[%c0_2, %c0_3, %c0_4] : memref<1x328x24xbf16, #tpu.memory_space<vmem>>, vector<1x328x24xbf16>
    %3 = vector.shape_cast %2 : vector<1x328x24xbf16> to vector<328x24xbf16>
    %4 = tpu.concatenate %1, %3 in 0 : vector<656x24xbf16>, vector<328x24xbf16> -> vector<984x24xbf16>
    %5 = vector.extract_strided_slice %4 {offsets = [0, 0], sizes = [656, 24], strides = [1, 1]} : vector<984x24xbf16> to vector<656x24xbf16>
    %c0_5 = arith.constant 0 : index
    %c0_6 = arith.constant 0 : index
    %c0_7 = arith.constant 0 : index
    %6 = vector.load %arg5[%c0_5, %c0_6, %c0_7] : memref<4x24x128xbf16, #tpu.memory_space<vmem>>, vector<1x24x128xbf16>
    %7 = vector.shape_cast %6 : vector<1x24x128xbf16> to vector<24x128xbf16>
    %cst = arith.constant dense<0.000000e+00> : vector<656x128xf32>
    %8 = tpu.matmul %5, %7, %cst {dimension_numbers = #tpu.dot_dimension_numbers<[1], [0], [0], [1], [0, 0, 1, 1], [], []>} : vector<656x24xbf16>, vector<24x128xbf16>, vector<656x128xf32> -> vector<656x128xf32>
    %9 = vector.extract_strided_slice %4 {offsets = [1, 0], sizes = [656, 24], strides = [1, 1]} : vector<984x24xbf16> to vector<656x24xbf16>
    %c1 = arith.constant 1 : index
    %c0_8 = arith.constant 0 : index
    %c0_9 = arith.constant 0 : index
    %10 = vector.load %arg5[%c1, %c0_8, %c0_9] : memref<4x24x128xbf16, #tpu.memory_space<vmem>>, vector<1x24x128xbf16>
    %11 = vector.shape_cast %10 : vector<1x24x128xbf16> to vector<24x128xbf16>
    %cst_10 = arith.constant dense<0.000000e+00> : vector<656x128xf32>
    %12 = tpu.matmul %9, %11, %cst_10 {dimension_numbers = #tpu.dot_dimension_numbers<[1], [0], [0], [1], [0, 0, 1, 1], [], []>} : vector<656x24xbf16>, vector<24x128xbf16>, vector<656x128xf32> -> vector<656x128xf32>
    %13 = arith.addf %8, %12 : vector<656x128xf32>
    %14 = vector.extract_strided_slice %4 {offsets = [41, 0], sizes = [656, 24], strides = [1, 1]} : vector<984x24xbf16> to vector<656x24xbf16>
    %c2 = arith.constant 2 : index
    %c0_11 = arith.constant 0 : index
    %c0_12 = arith.constant 0 : index
    %15 = vector.load %arg5[%c2, %c0_11, %c0_12] : memref<4x24x128xbf16, #tpu.memory_space<vmem>>, vector<1x24x128xbf16>
    %16 = vector.shape_cast %15 : vector<1x24x128xbf16> to vector<24x128xbf16>
    %cst_13 = arith.constant dense<0.000000e+00> : vector<656x128xf32>
    %17 = tpu.matmul %14, %16, %cst_13 {dimension_numbers = #tpu.dot_dimension_numbers<[1], [0], [0], [1], [0, 0, 1, 1], [], []>} : vector<656x24xbf16>, vector<24x128xbf16>, vector<656x128xf32> -> vector<656x128xf32>
    %18 = arith.addf %13, %17 : vector<656x128xf32>
    %19 = vector.extract_strided_slice %4 {offsets = [42, 0], sizes = [656, 24], strides = [1, 1]} : vector<984x24xbf16> to vector<656x24xbf16>
    %c3 = arith.constant 3 : index
    %c0_14 = arith.constant 0 : index
    %c0_15 = arith.constant 0 : index
    %20 = vector.load %arg5[%c3, %c0_14, %c0_15] : memref<4x24x128xbf16, #tpu.memory_space<vmem>>, vector<1x24x128xbf16>
    %21 = vector.shape_cast %20 : vector<1x24x128xbf16> to vector<24x128xbf16>
    %cst_16 = arith.constant dense<0.000000e+00> : vector<656x128xf32>
    %22 = tpu.matmul %19, %21, %cst_16 {dimension_numbers = #tpu.dot_dimension_numbers<[1], [0], [0], [1], [0, 0, 1, 1], [], []>} : vector<656x24xbf16>, vector<24x128xbf16>, vector<656x128xf32> -> vector<656x128xf32>
    %23 = arith.addf %18, %22 : vector<656x128xf32>
    %c0_17 = arith.constant 0 : index
    %c0_18 = arith.constant 0 : index
    %24 = vector.load %arg6[%c0_17, %c0_18] : memref<1x128xf32, #tpu.memory_space<vmem>>, vector<1x128xf32>
    %25 = vector.broadcast %24 : vector<1x128xf32> to vector<656x128xf32>
    %26 = arith.addf %23, %25 : vector<656x128xf32>
    %27 = vector.shape_cast %26 : vector<656x128xf32> to vector<1x656x128xf32>
    %c0_19 = arith.constant 0 : index
    %c0_20 = arith.constant 0 : index
    %c0_21 = arith.constant 0 : index
    %28 = vector.load %arg7[%c0_19, %c0_20, %c0_21] : memref<1x656x128xf32, #tpu.memory_space<vmem>>, vector<1x656x128xf32>
    tpu.vector_store %arg7[%c0_19, %c0_20, %c0_21], %27 {strides = array<i32>} : memref<1x656x128xf32, #tpu.memory_space<vmem>>, vector<1x656x128xf32>,
    return
  }
  func.func @transform_0(%arg0: i32, %arg1: i32, %arg2: i32) -> (i32, i32, i32) {
    %c0_i32 = arith.constant 0 : i32
    %c0_i32_0 = arith.constant 0 : i32
    return %arg0, %arg2, %c0_i32 : i32, i32, i32
  }
  func.func @transform_1(%arg0: i32, %arg1: i32, %arg2: i32) -> (i32, i32, i32) {
    %c1_i32 = arith.constant 1 : i32
    %0 = arith.addi %arg2, %c1_i32 : i32
    %c2_i32 = arith.constant 2 : i32
    %1 = arith.muli %0, %c2_i32 : i32
    %c0_i32 = arith.constant 0 : i32
    %c0_i32_0 = arith.constant 0 : i32
    return %arg0, %1, %c0_i32 : i32, i32, i32
  }
  func.func @transform_2(%arg0: i32, %arg1: i32, %arg2: i32) -> (i32, i32, i32) {
    %c0_i32 = arith.constant 0 : i32
    %c0_i32_0 = arith.constant 0 : i32
    %c0_i32_1 = arith.constant 0 : i32
    return %c0_i32, %c0_i32_0, %arg1 : i32, i32, i32
  }
  func.func @transform_3(%arg0: i32, %arg1: i32, %arg2: i32) -> (i32, i32) {
    %c0_i32 = arith.constant 0 : i32
    %c0_i32_0 = arith.constant 0 : i32
    return %c0_i32, %arg1 : i32, i32
  }
  func.func @transform_4(%arg0: i32, %arg1: i32, %arg2: i32) -> (i32, i32, i32) {
    %c0_i32 = arith.constant 0 : i32
    return %arg0, %arg2, %arg1 : i32, i32, i32
  }
}

</mosaic_0001>

<bundles_post_ra>
// kernel: tpu_custom_call.1
= control target key start
LH: loop header
LB: loop body
LE: loop exit
PB: predicated region body
PF: predicated region fallthrough
CT: control target
= control target key end

     0   :  { %9 = vsyncpa [#allocation3], 0  ;;  %s4854_s0 = inlined_call_operand.vmem [shape: bf16[2,2624,24], index: 0, kind: input, shape index: {}]   ;;  %s4855_s1 = inlined_call_operand.vmem [shape: bf16[2,2624,24], index: 1, kind: input, shape index: {}]   ;;  %s4856_s2 = inlined_call_operand.vmem [shape: bf16[4,24,128], index: 2, kind: input, shape index: {}]   ;;  %s4857_s3 = inlined_call_operand.vmem [shape: f32[1,128], index: 3, kind: input, shape index: {}]   ;;  %s4858_s4 = inlined_call_operand.hbm [shape: f32[2,1968,128], index: 4, kind: output, shape index: {}]  }
   0x1   :  { %11 = vsyncpa [#allocation3 + $0x1], 0  ;;  %s3714_s15 = smov 0   ;;  %s3716_s16 = smov 0  }
   0x2   :  { %s3718_s17 = smov 0   ;;  %s3720_s18 = smov 0  }
   0x3   :  { %s3722_s19 = smov 0   ;;  %s3724_s20 = smov 0  }
   0x4   :  { %s3726_s21 = smov 0   ;;  %s3728_s22 = smov 0  }
   0x5 LB: > { %s3077_s23 = sadd.s32 4294967295, %s3685_s22   ;;  %s3078_s24 = sadd.s32 4294967294, %s3685_s22   ;;  %s3685_s22 = sphi %s3728_s22, %s17_s22   ;;  %s3681_s21 = sphi %s3726_s21, %s4870_s21   ;;  %s3677_s20 = sphi %s3724_s20, %s4869_s20   ;;  %s3673_s19 = sphi %s3722_s19, %s4868_s19   ;;  %s3669_s18 = sphi %s3720_s18, %s4867_s18   ;;  %s3665_s17 = sphi %s3718_s17, %s4866_s17   ;;  %s3661_s16 = sphi %s3716_s16, %s4865_s16   ;;  %s3657_s15 = sphi %s3714_s15, %s4864_s15  }
   0x6   : > { %s29_s25 = sadd.s32 1, %s3677_s20  ;;  %s36_s26 = sadd.s32 1, %s3681_s21 }
   0x7   : > { %p30_p0 = scmp.ge.s32.totalorder %s29_s25, 3  ;;  %p169_p1 = scmp.ne.s32.totalorder %s3665_s17, %s3661_s16 }
   0x8   : > { %p170_p2 = scmp.eq.s32.totalorder %s3077_s23, 5  ;;  %p175_p5 = scmp.ne.s32.totalorder %s3661_s16, %s3657_s15 }
   0x9   : > { %s4872_s25 = smov (%p30_p0, %s29_s25), 0  ;;  %s4874_s26 = smov (!%p30_p0, %s36_s26), %s3681_s21 }
   0xa   : > { %s153_s27 = ssub.s32 %s3677_s20, %s4872_s25  ;;  %p3765_p3 = por %p170_p2, %p169_p1 }
   0xb   : > { %p38_p4 = scmp.ge.s32.totalorder %s4874_s26, 2  ;;  %p176_p6 = scmp.eq.s32.totalorder %s3078_s24, 5 }
   0xc   : > { %p3085_p7 = scmp.ge.s32.totalorder %s3685_s22, 1  ;;  %p237_p9 = scmp.lt.s32.totalorder %s3685_s22, 7 }
   0xd   : > { %s4876_s26 = smov (%p38_p4, %s4874_s26), 0  ;;  %p3774_p8 = por %p176_p6, %p175_p5 }
   0xe   : > { %4861 = sst [smem:[#allocation5_spill]] %s4876_s26  ;;  %s152_s30 = ssub.s32 %s3681_s21, %s4876_s26 }
   0xf   : > { %s159_s5 = sadd.s32 1, %s3665_s17  ;;  %s154_s6 = sor.u32 %s153_s27, %s152_s30 }
  0x10   : > { %p238_p10 = pnand %p3085_p7, %p237_p9  ;;  %p157_p11 = scmp.eq.s32.totalorder %s154_s6, 0 }
  0x11   : > { %s3798_s24 = smul.u32 (!%p238_p10), 82, %s3669_s18  ;;  %p286_p12 = scmp.lt.s32.totalorder (!%p238_p10), %s3673_s19, 1 }
  0x12   : > { %s3783_s7 = scalar_select %p157_p11, %s3665_s17, %s159_s5  }
  0x13   : > { %241 = sbr.rel (%p238_p10) target bundleno = 832 (0x340), region = 36  ;;  %p288_p13 = scmp.lt.s32.totalorder (!%p238_p10), %s3798_s24, 327 }
  0x14   : > { %s282_s26 = sand.u32 (!%p238_p10), 1, %s3661_s16   ;;  %s3514_s11 = smul.u32 (!%p238_p10), 246, %s3673_s19 }
  0x15   : > { %s3611_s9 = scalar_lea.hbm (!%p238_p10), %s4858_s4, 3936 }
  0x16   : > { %s2940_s13 = sadd.s32 (!%p238_p10), %s3514_s11, %s3798_s24 }
  0x17   : > { %s3455_s14 = sshll.u32 (!%p238_p10), %s2940_s13, 3 }
  0x18   : > { %v628_v0 = vld [vmem:[%s4856_s2 + $0x8] sm:$0xf]  ;;  %v3409_v1 = vld [vmem:[%s4856_s2 + $0x2c] sm:$0xf]  ;;  %v3268_v4 = vld [vmem:[%s4856_s2 + $0x14] sm:$0xf] }
  0x19   : > { %v1322_v2 = vunpack.c.l.b16 %v628_v0  ;;  %v2333_v3 = vunpack.c.l.b16 %v3409_v1  ;;  %v3361_v5 = vld [vmem:[%s4856_s2 + $0x20] sm:$0xf]  ;;  %vm1099_vm0 = vcmask 1043456   ;;  %v971_v6 = vunpack.c.l.b16 %v3268_v4  ;;  %s3803_s27 = scalar_select %p286_p12, %s3673_s19, 1  ;;  %v3511_v17 = vld [vmem:[%s4856_s2 + $0x24] sm:$0xff]  ;;  %v3509_v18 = vld [vmem:[%s4856_s2 + $0xc] sm:$0xff] }
  0x1a   : > { %v1814_v7 = vunpack.c.l.b16 %v3361_v5  ;;  %s289_s30 = scalar_select %p288_p13, %s3798_s24, 327  ;;  %v3508_v15 = vld [vmem:[%s4856_s2] sm:$0xff]  ;;  %v3510_v19 = vld [vmem:[%s4856_s2 + $0x18] sm:$0xff]  ;;  %vm975_vm1 = vcmask 195584   ;;  %vm2244_vm2 = vcmask 1042432  }
  0x1b   : > { %v1324_v8 = vpack.c.b16 %v1322_v2, %v1322_v2  ;;  %v2335_v9 = vpack.c.b16 %v2333_v3, %v2333_v3  ;;  %v973_v10 = vpack.c.b16 %v971_v6, %v971_v6  ;;  %s3513_s10 = smul.u32 328, %s3803_s27  ;;  %vm633_vm3 = vsmask.f32 7424  ;;  %s2942_s19 = scalar_lea.hbm %s4858_s4, %s3455_s14 }
  0x1c   : > { %v1816_v11 = vpack.c.b16 %v1814_v7, %v1814_v7  ;;  %vm1629_vm4 = vsmask.f32 3328  ;;  %s2945_s24 = sshll.u32 %s2942_s19, 4  ;;  %s2946_s24 = int_to_ptr.hbm [resolvable:$true] %s2945_s24 }
  0x1d   : > { %v1409_v12 = vsel %vm1099_vm0, %v1324_v8, 0  ;;  %v2461_v13 = vsel %vm1099_vm0, %v2335_v9, 0  ;;  %v1101_v14 = vsel %vm1099_vm0, %v973_v10, 0  ;;  %s291_s23 = sadd.s32 %s3513_s10, %s289_s30  ;;  %s3512_s30 = smul.u32 656, %s282_s26 }
  0x1e   : > { %1417 = vmatpush.bf16.msra.mxu1 %v1409_v12  ;;  %2469 = vmatpush.bf16.msra.mxu3 %v2461_v13  ;;  %v1942_v16 = vsel %vm1099_vm0, %v1816_v11, 0  ;;  %s3086_s5 = sshll.u32 %s291_s23, 2  ;;  %s295_s23 = sadd.s32 1, %s3669_s18 }
  0x1f   : > { %1109 = vmatpush.bf16.msra.mxu0 %v1101_v14  ;;  %1950 = vmatpush.bf16.msra.mxu2 %v1942_v16  ;;  %s3828_s8 = scalar_lea.vmem %s4854_s0, %s3086_s5  ;;  %s3958_s12 = scalar_lea.vmem [#allocation2], %s3512_s30 }
  0x20   : > { %v3464_v20 = vld [vmem:[%s3828_s8] sm:$0xff]  ;;  %v3466_v21 = vld [vmem:[%s3828_s8 + $0x10] sm:$0xff]  ;;  %v3833_v22 = vld [vmem:[%s3828_s8 + $0x18] sm:$0xff]  ;;  %s3088_s5 = smul.u32 82, %s295_s23 }
  0x21   : > { %v3465_v23 = vld [vmem:[%s3828_s8 + $0x8] sm:$0xff]  ;;  %v637_v24 = vshll.u32 %v3464_v20, 16  ;;  %v2245_v25 = vrot.slane %v3466_v21, 5  ;;  %v2246_v26 = vrot.slane %v3833_v22, 5  ;;  %v635_v27 = vshrl.u32 %v3464_v20, 16  ;;  %v3468_v44 = vld [vmem:[%s3828_s8 + $0x20] sm:$0xff] }
  0x22   : > { %1418 = vmatpush.bf16.msra.mxu1 %v3508_v15  ;;  %2470 = vmatpush.bf16.msra.mxu3 %v3511_v17  ;;  %v642_v28 = vshll.u32 %v3465_v23, 16  ;;  %v650_v29 = vshll.u32 %v3466_v21, 16  ;;  %v654_v30 = vshrl.u32 %v3466_v21, 16  ;;  %v658_v31 = vshll.u32 %v3833_v22, 16  ;;  %v3469_v58 = vld [vmem:[%s3828_s8 + $0x28] sm:$0xff]  ;;  %v3470_v6 = vld [vmem:[%s3828_s8 + $0x30] sm:$0xff] }
  0x23   : > { %1110 = vmatpush.bf16.msra.mxu0 %v3509_v18  ;;  %1951 = vmatpush.bf16.msra.mxu2 %v3510_v19  ;;  %v2247_v32 = vsel %vm2244_vm2, %v2245_v25, %v2246_v26  ;;  %v639_v33 = vrot.slane %v637_v24, 1  ;;  %v662_v34 = vshrl.u32 %v3833_v22, 16  ;;  %v666_v46 = vshll.u32 %v3468_v44, 16  ;;  %v3471_v18 = vld [vmem:[%s3828_s8 + $0x38] sm:$0xff]  ;;  %p300_p0 = scmp.lt.s32.totalorder %s3088_s5, 327 }
  0x24   : > { %v644_v35 = vrot.slane %v642_v28, 1  ;;  %v1630_v36 = vrot.slane %v654_v30, 4  ;;  %v1631_v37 = vrot.slane %v650_v29, 5  ;;  %v1634_v38 = vrot.slane %v658_v31, 5 }
  0x25   : > { %3318 = vmatmul.msk.bf16.vlgmr.msra.gmra.mxu1 %vm975_vm1, %v3464_v20  ;;  %3414 = vmatmul.msk.bf16.vlgmr.msra.gmra.mxu3 %vm975_vm1, %v2247_v32  ;;  %v640_v39 = vor.u32 %v639_v33, %v635_v27  ;;  %v1633_v40 = vrot.slane %v662_v34, 4  ;;  %v670_v47 = vshrl.u32 %v3468_v44, 16  ;;  %v2248_v48 = vrot.slane %v3468_v44, 5  ;;  %s4878_s5 = smov (!%p300_p0, %s3088_s5), 327 }
  0x26   : > { %v1632_v41 = vor.u32 %v1631_v37, %v1630_v36  ;;  %v646_v49 = vshrl.u32 %v3465_v23, 16  ;;  %v1638_v51 = vrot.slane %v666_v46, 5  ;;  %v652_v54 = vrot.slane %v650_v29, 1  ;;  %s303_s18 = sadd.s32 %s3513_s10, %s4878_s5  ;;  %s3605_s10 = sshra.s32 %s2946_s24, 4  ;;  %s3606_s10 = int_to_ptr.hbm [resolvable:$true] %s3605_s10 }
  0x27   : > { %v645_v42 = vsel %vm633_vm3, %v640_v39, %v644_v35  ;;  %v1635_v43 = vor.u32 %v1634_v38, %v1633_v40  ;;  %v1637_v50 = vrot.slane %v670_v47, 4  ;;  %v2249_v52 = vsel %vm2244_vm2, %v2246_v26, %v2248_v48  ;;  %s3089_s27 = sshll.u32 %s303_s18, 2  ;;  %s2943_s18 = sshll.u32 %s3958_s12, 4  ;;  %s2944_s18 = int_to_ptr.vmem [resolvable:$true] %s2943_s18 }
  0x28   : > { %3273 = vmatmul.msk.bf16.vlgmr.msra.gmra.mxu0 %vm975_vm1, %v645_v42  ;;  %v648_v53 = vor.u32 %v646_v49, %v644_v35  ;;  %v674_v59 = vshll.u32 %v3469_v58, 16  ;;  %v678_v60 = vshrl.u32 %v3469_v58, 16  ;;  %v2250_v61 = vrot.slane %v3469_v58, 5  ;;  %v3886_v42 = vld [vmem:[%s3828_s8 + $0x48] sm:$0xff]  ;;  %s3607_s6 = scalar_lea.hbm %s3606_s10, 656  ;;  %p3612_p5 = scmp.lt.s32.totalorder %s3606_s10, %s4858_s4 }
  0x29   : > { %v1636_v45 = vsel %vm1629_vm4, %v1632_v41, %v1635_v43  ;;  %v1639_v55 = vor.u32 %v1638_v51, %v1637_v50  ;;  %v656_v1 = vor.u32 %v654_v30, %v652_v54  ;;  %v660_v2 = vrot.slane %v658_v31, 1  ;;  %v3472_v30 = vld [vmem:[%s3828_s8 + $0x40] sm:$0xff]  ;;  %p3608_p1 = scmp.ne.s32.totalorder %s3606_s10, %s3607_s6  ;;  %p3613_p6 = scmp.lt.s32.totalorder %s3611_s9, %s3607_s6 }
  0x2a   : > { %3366 = vmatmul.msk.bf16.vlgmr.msra.gmra.mxu2 %vm975_vm1, %v1636_v45  ;;  %v653_v56 = vsel %vm633_vm3, %v648_v53, %v652_v54  ;;  %v1641_v62 = vrot.slane %v678_v60, 4  ;;  %v1642_v63 = vrot.slane %v674_v59, 5  ;;  %v2251_v0 = vsel %vm2244_vm2, %v2248_v48, %v2250_v61  ;;  %v3901_v54 = vld [vmem:[%s3828_s8 + $0x50] sm:$0xff] }
  0x2b   : > { %v1640_v57 = vsel %vm1629_vm4, %v1635_v43, %v1639_v55  ;;  %v661_v4 = vsel %vm633_vm3, %v656_v1, %v660_v2  ;;  %v682_v7 = vshll.u32 %v3470_v6, 16  ;;  %v686_v8 = vshrl.u32 %v3470_v6, 16  ;;  %p3609_p2 = pnand %p3608_p1, %p3765_p3  ;;  %p3614_p7 = por %p3613_p6, %p3612_p5 }
  0x2c   : > { %v1643_v3 = vor.u32 %v1642_v63, %v1641_v62  ;;  %v2252_v9 = vrot.slane %v3470_v6, 5  ;;  %v664_v13 = vor.u32 %v662_v34, %v660_v2  ;;  %v668_v14 = vrot.slane %v666_v46, 1  ;;  %v3916_v2 = vld [vmem:[%s3828_s8 + $0x58] sm:$0xff] }
  0x2d   : > { %v1645_v10 = vrot.slane %v686_v8, 4  ;;  %v1646_v11 = vrot.slane %v682_v7, 5  ;;  %v690_v19 = vshll.u32 %v3471_v18, 16  ;;  %v694_v20 = vshrl.u32 %v3471_v18, 16  ;;  %p3610_p4 = pneg %p3609_p2 }
  0x2e   : > { %v1644_v5 = vsel %vm1629_vm4, %v1639_v55, %v1643_v3  ;;  %v2253_v12 = vsel %vm2244_vm2, %v2250_v61, %v2252_v9  ;;  %v669_v16 = vsel %vm633_vm3, %v664_v13, %v668_v14  ;;  %v672_v25 = vor.u32 %v670_v47, %v668_v14 }
  0x2f   : > { %v1647_v15 = vor.u32 %v1646_v11, %v1645_v10  ;;  %v676_v26 = vrot.slane %v674_v59, 1  ;;  %v698_v31 = vshll.u32 %v3472_v30, 16  ;;  %v702_v32 = vshrl.u32 %v3472_v30, 16  ;;  %p3615_p9 = pnand %p3614_p7, %p3610_p4 }
  0x30   : > { %v2256_v33 = vrot.slane %v3472_v30, 5  ;;  %v684_v38 = vrot.slane %v682_v7, 1  ;;  %v706_v43 = vshll.u32 %v3886_v42, 16  ;;  %v2258_v45 = vrot.slane %v3886_v42, 5 }
  0x31   : > { %v1648_v17 = vsel %vm1629_vm4, %v1643_v3, %v1647_v15  ;;  %v677_v28 = vsel %vm633_vm3, %v672_v25, %v676_v26  ;;  %v1653_v34 = vrot.slane %v702_v32, 4  ;;  %v1654_v35 = vrot.slane %v698_v31, 5 }
  0x32   : > { %v680_v37 = vor.u32 %v678_v60, %v676_v26  ;;  %v1658_v47 = vrot.slane %v706_v43, 5  ;;  %v2259_v48 = vsel %vm2244_vm2, %v2256_v33, %v2258_v45  ;;  %v688_v49 = vor.u32 %v686_v8, %v684_v38  ;;  %v3946_v26 = vld [vmem:[%s4857_s3] ss:$0 sm:$0xff] }
  0x33   : > { %v1655_v39 = vor.u32 %v1654_v35, %v1653_v34  ;;  %v692_v50 = vrot.slane %v690_v19, 1  ;;  %v714_v55 = vshll.u32 %v3901_v54, 16  ;;  %v700_v62 = vrot.slane %v698_v31, 1 }
  0x34   : > { %v685_v40 = vsel %vm633_vm3, %v680_v37, %v684_v38  ;;  %v722_v3 = vshll.u32 %v3916_v2, 16  ;;  %v708_v11 = vrot.slane %v706_v43, 1 }
  0x35   : > { %3319 = vmatmul.msk.bf16.gmra.mxu1 %vm975_vm1, %v3465_v23  ;;  %3415 = vmatmul.msk.bf16.gmra.mxu3 %vm975_vm1, %v2249_v52  ;;  %v1650_v23 = vrot.slane %v690_v19, 5  ;;  %v693_v52 = vsel %vm633_vm3, %v688_v49, %v692_v50  ;;  %v1662_v59 = vrot.slane %v714_v55, 5  ;;  %v696_v61 = vor.u32 %v694_v20, %v692_v50 }
  0x36   : > { %v1666_v8 = vrot.slane %v722_v3, 5  ;;  %v704_v10 = vor.u32 %v702_v32, %v700_v62  ;;  %v716_v34 = vrot.slane %v714_v55, 1 }
  0x38   : > { %3274 = vmatmul.msk.bf16.gmra.mxu0 %vm975_vm1, %v653_v56  ;;  %v718_v56 = vshrl.u32 %v3901_v54, 16  ;;  %v709_v14 = vsel %vm633_vm3, %v704_v10, %v708_v11 }
  0x3a   : > { %3367 = vmatmul.msk.bf16.gmra.mxu2 %vm975_vm1, %v1640_v57  ;;  %v2260_v57 = vrot.slane %v3901_v54, 5 }
  0x3c   : > { %v2261_v60 = vsel %vm2244_vm2, %v2258_v45, %v2260_v57  ;;  %v3965_v45 = vld [vmem:[%s3828_s8 + $0x68] sm:$0xff] }
  0x3d   : > { %v738_v49 = vshll.u32 %v3965_v45, 16  ;;  %v742_v50 = vshrl.u32 %v3965_v45, 16 }
  0x45   : > { %3320 = vmatmul.msk.bf16.gmra.mxu1 %vm975_vm1, %v3466_v21  ;;  %3416 = vmatmul.msk.bf16.gmra.mxu3 %vm975_vm1, %v2251_v0  ;;  %v2254_v21 = vrot.slane %v3471_v18, 5  ;;  %v701_v0 = vsel %vm633_vm3, %v696_v61, %v700_v62 }
  0x47   : > { %v2255_v24 = vsel %vm2244_vm2, %v2252_v9, %v2254_v21  ;;  %v2257_v36 = vsel %vm2244_vm2, %v2254_v21, %v2256_v33 }
  0x48   : > { %3275 = vmatmul.msk.bf16.gmra.mxu0 %vm975_vm1, %v661_v4  ;;  %v726_v4 = vshrl.u32 %v3916_v2, 16 }
  0x4a   : > { %3368 = vmatmul.msk.bf16.gmra.mxu2 %vm975_vm1, %v1644_v5  ;;  %v2262_v5 = vrot.slane %v3916_v2, 5  ;;  %v1665_v7 = vrot.slane %v726_v4, 4 }
  0x4c   : > { %v2263_v9 = vsel %vm2244_vm2, %v2260_v57, %v2262_v5 }
  0x55   : > { %3321 = vmatmul.msk.bf16.gmra.mxu1 %vm975_vm1, %v3833_v22  ;;  %3417 = vmatmul.msk.bf16.gmra.mxu3 %vm975_vm1, %v2253_v12  ;;  %v1649_v22 = vrot.slane %v694_v20, 4  ;;  %v1667_v12 = vor.u32 %v1666_v8, %v1665_v7 }
  0x57   : > { %v1651_v27 = vor.u32 %v1650_v23, %v1649_v22 }
  0x58   : > { %3276 = vmatmul.msk.bf16.gmra.mxu0 %vm975_vm1, %v669_v16 }
  0x59   : > { %v1652_v29 = vsel %vm1629_vm4, %v1647_v15, %v1651_v27  ;;  %v1656_v41 = vsel %vm1629_vm4, %v1651_v27, %v1655_v39 }
  0x5a   : > { %3369 = vmatmul.msk.bf16.gmra.mxu2 %vm975_vm1, %v1648_v17 }
  0x65   : > { %3322 = vmatmul.msk.bf16.gmra.mxu1 %vm975_vm1, %v3468_v44  ;;  %3418 = vmatmul.msk.bf16.gmra.mxu3 %vm975_vm1, %v2255_v24  ;;  %v710_v44 = vshrl.u32 %v3886_v42, 16 }
  0x67   : > { %v1657_v46 = vrot.slane %v710_v44, 4  ;;  %v712_v33 = vor.u32 %v710_v44, %v708_v11 }
  0x68   : > { %3277 = vmatmul.msk.bf16.gmra.mxu0 %vm975_vm1, %v677_v28 }
  0x69   : > { %v1659_v51 = vor.u32 %v1658_v47, %v1657_v46 }
  0x6a   : > { %3370 = vmatmul.msk.bf16.gmra.mxu2 %vm975_vm1, %v1652_v29 }
  0x6b   : > { %v1660_v53 = vsel %vm1629_vm4, %v1655_v39, %v1659_v51 }
  0x75   : > { %3323 = vmatmul.msk.bf16.gmra.mxu1 %vm975_vm1, %v3469_v58  ;;  %3419 = vmatmul.msk.bf16.gmra.mxu3 %vm975_vm1, %v2257_v36  ;;  %v1661_v58 = vrot.slane %v718_v56, 4 }
  0x77   : > { %v1663_v63 = vor.u32 %v1662_v59, %v1661_v58  ;;  %v1673_v59 = vrot.slane %v742_v50, 4 }
  0x78   : > { %3278 = vmatmul.msk.bf16.gmra.mxu0 %vm975_vm1, %v685_v40  ;;  %v717_v40 = vsel %vm633_vm3, %v712_v33, %v716_v34 }
  0x79   : > { %v1664_v1 = vsel %vm1629_vm4, %v1659_v51, %v1663_v63  ;;  %v1668_v17 = vsel %vm1629_vm4, %v1663_v63, %v1667_v12  ;;  %v720_v63 = vor.u32 %v718_v56, %v716_v34  ;;  %v3991_v56 = vld [vmem:[%s3828_s8 + $0x70] sm:$0xff] }
  0x7a   : > { %3371 = vmatmul.msk.bf16.gmra.mxu2 %vm975_vm1, %v1656_v41 }
  0x85   : > { %3324 = vmatmul.msk.bf16.gmra.mxu1 %vm975_vm1, %v3470_v6  ;;  %3420 = vmatmul.msk.bf16.gmra.mxu3 %vm975_vm1, %v2259_v48 }
  0x88   : > { %3279 = vmatmul.msk.bf16.gmra.mxu0 %vm975_vm1, %v693_v52 }
  0x8a   : > { %3372 = vmatmul.msk.bf16.gmra.mxu2 %vm975_vm1, %v1660_v53  ;;  %v2266_v53 = vrot.slane %v3965_v45, 5 }
  0x95   : > { %3325 = vmatmul.msk.bf16.gmra.mxu1 %vm975_vm1, %v3471_v18  ;;  %3421 = vmatmul.msk.bf16.gmra.mxu3 %vm975_vm1, %v2261_v60  ;;  %v3933_v18 = vld [vmem:[%s3828_s8 + $0x60] sm:$0xff]  ;;  %v1674_v60 = vrot.slane %v738_v49, 5 }
  0x96   : > { %v730_v20 = vshll.u32 %v3933_v18, 16  ;;  %v734_v21 = vshrl.u32 %v3933_v18, 16  ;;  %v2264_v24 = vrot.slane %v3933_v18, 5 }
  0x98   : > { %3280 = vmatmul.msk.bf16.gmra.mxu0 %vm975_vm1, %v701_v0  ;;  %v1669_v29 = vrot.slane %v734_v21, 4  ;;  %v2265_v32 = vsel %vm2244_vm2, %v2262_v5, %v2264_v24  ;;  %v2267_v62 = vsel %vm2244_vm2, %v2264_v24, %v2266_v53  ;;  %v724_v0 = vrot.slane %v722_v3, 1 }
  0x99   : > { %v1675_v5 = vor.u32 %v1674_v60, %v1673_v59 }
  0x9a   : > { %3373 = vmatmul.msk.bf16.gmra.mxu2 %vm975_vm1, %v1664_v1 }
  0xa2   : > { %v1420_v6 = vpop.f32.mrf.mxu1 }
  0xa5   : > { %3326 = vmatmul.msk.bf16.gmra.mxu1 %vm975_vm1, %v3472_v30  ;;  %3422 = vmatmul.msk.bf16.gmra.mxu3 %vm975_vm1, %v2263_v9  ;;  %v1112_v13 = vpop.f32.mrf.mxu0  ;;  %v1670_v30 = vrot.slane %v730_v20, 5  ;;  %v725_v9 = vsel %vm633_vm3, %v720_v63, %v724_v0 }
  0xa6   : > { %v1421_v19 = vadd.f32 %v1420_v6, %v1112_v13 }
  0xa7   : > { %v1671_v36 = vor.u32 %v1670_v30, %v1669_v29 }
  0xa8   : > { %v2472_v16 = vpop.f32.mrf.mxu3  ;;  %3281 = vmatmul.msk.bf16.gmra.mxu0 %vm975_vm1, %v709_v14 }
  0xa9   : > { %v1672_v44 = vsel %vm1629_vm4, %v1667_v12, %v1671_v36 }
  0xaa   : > { %v1422_v15 = vpop.f32.mrf.mxu1  ;;  %3374 = vmatmul.msk.bf16.gmra.mxu2 %vm975_vm1, %v1668_v17 }
  0xad   : > { %v1953_v22 = vpop.f32.mrf.mxu2  ;;  %v1114_v23 = vpop.f32.mrf.mxu0 }
  0xae   : > { %v2158_v25 = vadd.f32 %v1953_v22, %v1421_v19  ;;  %v1423_v37 = vadd.f32 %v1422_v15, %v1114_v23  ;;  %v746_v15 = vshll.u32 %v3991_v56, 16  ;;  %v2268_v22 = vrot.slane %v3991_v56, 5 }
  0xb0   : > { %v2474_v28 = vpop.f32.mrf.mxu3  ;;  %v2677_v31 = vadd.f32 %v2472_v16, %v2158_v25  ;;  %v750_v16 = vshrl.u32 %v3991_v56, 16  ;;  %v2269_v30 = vsel %vm2244_vm2, %v2266_v53, %v2268_v22 }
  0xb2   : > { %v1425_v27 = vpop.f32.mrf.mxu1  ;;  %v2763_v35 = vadd.f32 %v3946_v26, %v2677_v31  ;;  %v728_v31 = vor.u32 %v726_v4, %v724_v0  ;;  %v4017_v4 = vld [vmem:[%s3828_s8 + $0x78] sm:$0xff] }
  0xb4   : > { %2845 = vst [vmem:[%s3958_s12] sm:$0xff] %v2763_v35 }
  0xb5   : > { %3327 = vmatmul.msk.bf16.gmra.mxu1 %vm975_vm1, %v3886_v42  ;;  %3423 = vmatmul.msk.bf16.gmra.mxu3 %vm975_vm1, %v2265_v32  ;;  %v1955_v38 = vpop.f32.mrf.mxu2  ;;  %v1117_v39 = vpop.f32.mrf.mxu0  ;;  %v732_v32 = vrot.slane %v730_v20, 1 }
  0xb6   : > { %v2159_v41 = vadd.f32 %v1955_v38, %v1423_v37  ;;  %v1426_v48 = vadd.f32 %v1425_v27, %v1117_v39  ;;  %v1677_v27 = vrot.slane %v750_v16, 4 }
  0xb7   : > { %v733_v38 = vsel %vm633_vm3, %v728_v31, %v732_v32 }
  0xb8   : > { %v2477_v43 = vpop.f32.mrf.mxu3  ;;  %v2678_v46 = vadd.f32 %v2474_v28, %v2159_v41  ;;  %3282 = vmatmul.msk.bf16.gmra.mxu0 %vm975_vm1, %v717_v40  ;;  %v1678_v28 = vrot.slane %v746_v15, 5 }
  0xba   : > { %v1427_v42 = vpop.f32.mrf.mxu1  ;;  %v2764_v47 = vadd.f32 %v3946_v26, %v2678_v46  ;;  %3375 = vmatmul.msk.bf16.gmra.mxu2 %vm975_vm1, %v1672_v44  ;;  %v1679_v34 = vor.u32 %v1678_v28, %v1677_v27  ;;  %v754_v44 = vshll.u32 %v4017_v4, 16  ;;  %v758_v46 = vshrl.u32 %v4017_v4, 16 }
  0xbc   : > { %2846 = vst [vmem:[%s3958_s12 + $0x8] sm:$0xff] %v2764_v47 }
  0xbd   : > { %v1958_v51 = vpop.f32.mrf.mxu2  ;;  %v1119_v52 = vpop.f32.mrf.mxu0 }
  0xbe   : > { %v2160_v55 = vadd.f32 %v1958_v51, %v1426_v48  ;;  %v1428_v6 = vadd.f32 %v1427_v42, %v1119_v52  ;;  %v2270_v51 = vrot.slane %v4017_v4, 5 }
  0xc0   : > { %v2479_v58 = vpop.f32.mrf.mxu3  ;;  %v2679_v61 = vadd.f32 %v2477_v43, %v2160_v55  ;;  %v2271_v60 = vsel %vm2244_vm2, %v2268_v22, %v2270_v51 }
  0xc2   : > { %v1430_v57 = vpop.f32.mrf.mxu1  ;;  %v2765_v1 = vadd.f32 %v3946_v26, %v2679_v61  ;;  %v736_v61 = vor.u32 %v734_v21, %v732_v32  ;;  %v4043_v21 = vld [vmem:[%s3828_s8 + $0x80] sm:$0xff] }
  0xc4   : > { %2847 = vst [vmem:[%s3958_s12 + $0x10] sm:$0xff] %v2765_v1 }
  0xc5   : > { %3328 = vmatmul.msk.bf16.gmra.mxu1 %vm975_vm1, %v3901_v54  ;;  %3424 = vmatmul.msk.bf16.gmra.mxu3 %vm975_vm1, %v2267_v62  ;;  %v1960_v7 = vpop.f32.mrf.mxu2  ;;  %v1122_v8 = vpop.f32.mrf.mxu0  ;;  %v1676_v54 = vsel %vm1629_vm4, %v1671_v36, %v1675_v5  ;;  %v740_v62 = vrot.slane %v738_v49, 1 }
  0xc6   : > { %v2161_v10 = vadd.f32 %v1960_v7, %v1428_v6  ;;  %v1431_v14 = vadd.f32 %v1430_v57, %v1122_v8  ;;  %v1681_v57 = vrot.slane %v758_v46, 4 }
  0xc7   : > { %v741_v7 = vsel %vm633_vm3, %v736_v61, %v740_v62 }
  0xc8   : > { %v2482_v12 = vpop.f32.mrf.mxu3  ;;  %v2680_v3 = vadd.f32 %v2479_v58, %v2161_v10  ;;  %3283 = vmatmul.msk.bf16.gmra.mxu0 %vm975_vm1, %v725_v9  ;;  %v1682_v58 = vrot.slane %v754_v44, 5 }
  0xca   : > { %v1432_v11 = vpop.f32.mrf.mxu1  ;;  %v2766_v13 = vadd.f32 %v3946_v26, %v2680_v3  ;;  %3376 = vmatmul.msk.bf16.gmra.mxu2 %vm975_vm1, %v1676_v54  ;;  %v1683_v0 = vor.u32 %v1682_v58, %v1681_v57  ;;  %v762_v54 = vshll.u32 %v4043_v21, 16  ;;  %v766_v3 = vshrl.u32 %v4043_v21, 16 }
  0xcc   : > { %2848 = vst [vmem:[%s3958_s12 + $0x18] sm:$0xff] %v2766_v13 }
  0xcd   : > { %v1963_v17 = vpop.f32.mrf.mxu2  ;;  %v1124_v19 = vpop.f32.mrf.mxu0 }
  0xce   : > { %v2162_v23 = vadd.f32 %v1963_v17, %v1431_v14  ;;  %v1433_v35 = vadd.f32 %v1432_v11, %v1124_v19  ;;  %v2272_v17 = vrot.slane %v4043_v21, 5 }
  0xd0   : > { %v2484_v25 = vpop.f32.mrf.mxu3  ;;  %v2681_v29 = vadd.f32 %v2482_v12, %v2162_v23  ;;  %v2273_v28 = vsel %vm2244_vm2, %v2270_v51, %v2272_v17 }
  0xd2   : > { %v1435_v24 = vpop.f32.mrf.mxu1  ;;  %v2767_v33 = vadd.f32 %v3946_v26, %v2681_v29  ;;  %v744_v29 = vor.u32 %v742_v50, %v740_v62  ;;  %v4069_v50 = vld [vmem:[%s3828_s8 + $0x88] sm:$0xff] }
  0xd4   : > { %2849 = vst [vmem:[%s3958_s12 + $0x20] sm:$0xff] %v2767_v33 }
  0xd5   : > { %3329 = vmatmul.msk.bf16.gmra.mxu1 %vm975_vm1, %v3916_v2  ;;  %3425 = vmatmul.msk.bf16.gmra.mxu3 %vm975_vm1, %v2269_v30  ;;  %v1965_v36 = vpop.f32.mrf.mxu2  ;;  %v1127_v37 = vpop.f32.mrf.mxu0  ;;  %v1680_v2 = vsel %vm1629_vm4, %v1675_v5, %v1679_v34  ;;  %v748_v30 = vrot.slane %v746_v15, 1 }
  0xd6   : > { %v2163_v39 = vadd.f32 %v1965_v36, %v1433_v35  ;;  %v1436_v43 = vadd.f32 %v1435_v24, %v1127_v37  ;;  %v1685_v24 = vrot.slane %v766_v3, 4 }
  0xd7   : > { %v749_v36 = vsel %vm633_vm3, %v744_v29, %v748_v30 }
  0xd8   : > { %v2487_v41 = vpop.f32.mrf.mxu3  ;;  %v2682_v20 = vadd.f32 %v2484_v25, %v2163_v39  ;;  %3284 = vmatmul.msk.bf16.gmra.mxu0 %vm975_vm1, %v733_v38  ;;  %v1686_v25 = vrot.slane %v762_v54, 5 }
  0xda   : > { %v1437_v40 = vpop.f32.mrf.mxu1  ;;  %v2768_v42 = vadd.f32 %v3946_v26, %v2682_v20  ;;  %3377 = vmatmul.msk.bf16.gmra.mxu2 %vm975_vm1, %v1680_v2  ;;  %v1687_v32 = vor.u32 %v1686_v25, %v1685_v24  ;;  %v770_v2 = vshll.u32 %v4069_v50, 16  ;;  %v774_v20 = vshrl.u32 %v4069_v50, 16 }
  0xdc   : > { %2850 = vst [vmem:[%s3958_s12 + $0x28] sm:$0xff] %v2768_v42 }
  0xdd   : > { %v1968_v47 = vpop.f32.mrf.mxu2  ;;  %v1129_v48 = vpop.f32.mrf.mxu0 }
  0xde   : > { %v2164_v52 = vadd.f32 %v1968_v47, %v1436_v43  ;;  %v1438_v1 = vadd.f32 %v1437_v40, %v1129_v48  ;;  %v2274_v47 = vrot.slane %v4069_v50, 5 }
  0xe0   : > { %v2489_v55 = vpop.f32.mrf.mxu3  ;;  %v2683_v59 = vadd.f32 %v2487_v41, %v2164_v52  ;;  %v2275_v58 = vsel %vm2244_vm2, %v2272_v17, %v2274_v47 }
  0xe2   : > { %v1440_v53 = vpop.f32.mrf.mxu1  ;;  %v2769_v63 = vadd.f32 %v3946_v26, %v2683_v59  ;;  %v752_v59 = vor.u32 %v750_v16, %v748_v30  ;;  %v4095_v16 = vld [vmem:[%s3828_s8 + $0x90] sm:$0xff] }
  0xe4   : > { %2851 = vst [vmem:[%s3958_s12 + $0x30] sm:$0xff] %v2769_v63 }
  0xe5   : > { %3330 = vmatmul.msk.bf16.gmra.mxu1 %vm975_vm1, %v3933_v18  ;;  %3426 = vmatmul.msk.bf16.gmra.mxu3 %vm975_vm1, %v2271_v60  ;;  %v1970_v5 = vpop.f32.mrf.mxu2  ;;  %v1132_v6 = vpop.f32.mrf.mxu0  ;;  %v1684_v18 = vsel %vm1629_vm4, %v1679_v34, %v1683_v0  ;;  %v756_v60 = vrot.slane %v754_v44, 1 }
  0xe6   : > { %v2165_v8 = vadd.f32 %v1970_v5, %v1438_v1  ;;  %v1441_v12 = vadd.f32 %v1440_v53, %v1132_v6  ;;  %v1689_v53 = vrot.slane %v774_v20, 4 }
  0xe7   : > { %v757_v5 = vsel %vm633_vm3, %v752_v59, %v756_v60 }
  0xe8   : > { %v2492_v10 = vpop.f32.mrf.mxu3  ;;  %v2684_v49 = vadd.f32 %v2489_v55, %v2165_v8  ;;  %3285 = vmatmul.msk.bf16.gmra.mxu0 %vm975_vm1, %v741_v7  ;;  %v1690_v55 = vrot.slane %v770_v2, 5 }
  0xea   : > { %v1442_v9 = vpop.f32.mrf.mxu1  ;;  %v2770_v11 = vadd.f32 %v3946_v26, %v2684_v49  ;;  %3378 = vmatmul.msk.bf16.gmra.mxu2 %vm975_vm1, %v1684_v18  ;;  %v1691_v62 = vor.u32 %v1690_v55, %v1689_v53  ;;  %v778_v18 = vshll.u32 %v4095_v16, 16  ;;  %v782_v49 = vshrl.u32 %v4095_v16, 16 }
  0xec   : > { %2852 = vst [vmem:[%s3958_s12 + $0x38] sm:$0xff] %v2770_v11 }
  0xed   : > { %v1973_v13 = vpop.f32.mrf.mxu2  ;;  %v1134_v14 = vpop.f32.mrf.mxu0 }
  0xee   : > { %v2166_v19 = vadd.f32 %v1973_v13, %v1441_v12  ;;  %v1443_v33 = vadd.f32 %v1442_v9, %v1134_v14  ;;  %v2276_v13 = vrot.slane %v4095_v16, 5 }
  0xf0   : > { %v2494_v23 = vpop.f32.mrf.mxu3  ;;  %v2685_v27 = vadd.f32 %v2492_v10, %v2166_v19  ;;  %v2277_v25 = vsel %vm2244_vm2, %v2274_v47, %v2276_v13 }
  0xf2   : > { %v1445_v22 = vpop.f32.mrf.mxu1  ;;  %v2771_v31 = vadd.f32 %v3946_v26, %v2685_v27  ;;  %v760_v27 = vor.u32 %v758_v46, %v756_v60  ;;  %v4121_v46 = vld [vmem:[%s3828_s8 + $0x98] sm:$0xff] }
  0xf4   : > { %2853 = vst [vmem:[%s3958_s12 + $0x40] sm:$0xff] %v2771_v31 }
  0xf5   : > { %3331 = vmatmul.msk.bf16.gmra.mxu1 %vm975_vm1, %v3965_v45  ;;  %3427 = vmatmul.msk.bf16.gmra.mxu3 %vm975_vm1, %v2273_v28  ;;  %v1975_v34 = vpop.f32.mrf.mxu2  ;;  %v1137_v35 = vpop.f32.mrf.mxu0  ;;  %v1688_v45 = vsel %vm1629_vm4, %v1683_v0, %v1687_v32  ;;  %v764_v28 = vrot.slane %v762_v54, 1 }
  0xf6   : > { %v2167_v37 = vadd.f32 %v1975_v34, %v1443_v33  ;;  %v1446_v41 = vadd.f32 %v1445_v22, %v1137_v35  ;;  %v1693_v22 = vrot.slane %v782_v49, 4 }
  0xf7   : > { %v765_v34 = vsel %vm633_vm3, %v760_v27, %v764_v28 }
  0xf8   : > { %v2497_v39 = vpop.f32.mrf.mxu3  ;;  %v2686_v15 = vadd.f32 %v2494_v23, %v2167_v37  ;;  %3286 = vmatmul.msk.bf16.gmra.mxu0 %vm975_vm1, %v749_v36  ;;  %v1694_v23 = vrot.slane %v778_v18, 5 }
  0xfa   : > { %v1447_v38 = vpop.f32.mrf.mxu1  ;;  %v2772_v40 = vadd.f32 %v3946_v26, %v2686_v15  ;;  %3379 = vmatmul.msk.bf16.gmra.mxu2 %vm975_vm1, %v1688_v45  ;;  %v1695_v30 = vor.u32 %v1694_v23, %v1693_v22  ;;  %v786_v45 = vshll.u32 %v4121_v46, 16  ;;  %v790_v15 = vshrl.u32 %v4121_v46, 16 }
  0xfc   : > { %2854 = vst [vmem:[%s3958_s12 + $0x48] sm:$0xff] %v2772_v40 }
  0xfd   : > { %v1978_v42 = vpop.f32.mrf.mxu2  ;;  %v1139_v43 = vpop.f32.mrf.mxu0 }
  0xfe   : > { %v2168_v48 = vadd.f32 %v1978_v42, %v1446_v41  ;;  %v1448_v63 = vadd.f32 %v1447_v38, %v1139_v43  ;;  %v2278_v42 = vrot.slane %v4121_v46, 5 }
 0x100   : > { %v2499_v52 = vpop.f32.mrf.mxu3  ;;  %v2687_v57 = vadd.f32 %v2497_v39, %v2168_v48  ;;  %v2279_v55 = vsel %vm2244_vm2, %v2276_v13, %v2278_v42 }
 0x102   : > { %v1450_v51 = vpop.f32.mrf.mxu1  ;;  %v2773_v61 = vadd.f32 %v3946_v26, %v2687_v57  ;;  %v768_v57 = vor.u32 %v766_v3, %v764_v28  ;;  %v4147_v3 = vld [vmem:[%s3828_s8 + $0xa0] sm:$0xff] }
 0x104   : > { %2855 = vst [vmem:[%s3958_s12 + $0x50] sm:$0xff] %v2773_v61 }
 0x105   : > { %3332 = vmatmul.msk.bf16.gmra.mxu1 %vm975_vm1, %v3991_v56  ;;  %3428 = vmatmul.msk.bf16.gmra.mxu3 %vm975_vm1, %v2275_v58  ;;  %v1980_v0 = vpop.f32.mrf.mxu2  ;;  %v1142_v1 = vpop.f32.mrf.mxu0  ;;  %v1692_v56 = vsel %vm1629_vm4, %v1687_v32, %v1691_v62  ;;  %v772_v58 = vrot.slane %v770_v2, 1 }
 0x106   : > { %v2169_v6 = vadd.f32 %v1980_v0, %v1448_v63  ;;  %v1451_v10 = vadd.f32 %v1450_v51, %v1142_v1  ;;  %v1697_v51 = vrot.slane %v790_v15, 4 }
 0x107   : > { %v773_v0 = vsel %vm633_vm3, %v768_v57, %v772_v58 }
 0x108   : > { %v2502_v8 = vpop.f32.mrf.mxu3  ;;  %v2688_v44 = vadd.f32 %v2499_v52, %v2169_v6  ;;  %3287 = vmatmul.msk.bf16.gmra.mxu0 %vm975_vm1, %v757_v5  ;;  %v1698_v52 = vrot.slane %v786_v45, 5 }
 0x10a   : > { %v1452_v7 = vpop.f32.mrf.mxu1  ;;  %v2774_v9 = vadd.f32 %v3946_v26, %v2688_v44  ;;  %3380 = vmatmul.msk.bf16.gmra.mxu2 %vm975_vm1, %v1692_v56  ;;  %v1699_v60 = vor.u32 %v1698_v52, %v1697_v51  ;;  %v794_v56 = vshll.u32 %v4147_v3, 16  ;;  %v798_v44 = vshrl.u32 %v4147_v3, 16 }
 0x10c   : > { %2856 = vst [vmem:[%s3958_s12 + $0x58] sm:$0xff] %v2774_v9 }
 0x10d   : > { %v1983_v11 = vpop.f32.mrf.mxu2  ;;  %v1144_v12 = vpop.f32.mrf.mxu0 }
 0x10e   : > { %v2170_v14 = vadd.f32 %v1983_v11, %v1451_v10  ;;  %v1453_v31 = vadd.f32 %v1452_v7, %v1144_v12  ;;  %v2280_v11 = vrot.slane %v4147_v3, 5 }
 0x110   : > { %v2504_v19 = vpop.f32.mrf.mxu3  ;;  %v2689_v24 = vadd.f32 %v2502_v8, %v2170_v14  ;;  %v2281_v23 = vsel %vm2244_vm2, %v2278_v42, %v2280_v11 }
 0x112   : > { %v1455_v17 = vpop.f32.mrf.mxu1  ;;  %v2775_v29 = vadd.f32 %v3946_v26, %v2689_v24  ;;  %v776_v24 = vor.u32 %v774_v20, %v772_v58  ;;  %v4173_v20 = vld [vmem:[%s3828_s8 + $0xa8] sm:$0xff] }
 0x114   : > { %2857 = vst [vmem:[%s3958_s12 + $0x60] sm:$0xff] %v2775_v29 }
 0x115   : > { %3333 = vmatmul.msk.bf16.gmra.mxu1 %vm975_vm1, %v4017_v4  ;;  %3429 = vmatmul.msk.bf16.gmra.mxu3 %vm975_vm1, %v2277_v25  ;;  %v1985_v32 = vpop.f32.mrf.mxu2  ;;  %v1147_v33 = vpop.f32.mrf.mxu0  ;;  %v1696_v4 = vsel %vm1629_vm4, %v1691_v62, %v1695_v30  ;;  %v780_v25 = vrot.slane %v778_v18, 1 }
 0x116   : > { %v2171_v35 = vadd.f32 %v1985_v32, %v1453_v31  ;;  %v1456_v39 = vadd.f32 %v1455_v17, %v1147_v33  ;;  %v1701_v17 = vrot.slane %v798_v44, 4 }
 0x117   : > { %v781_v32 = vsel %vm633_vm3, %v776_v24, %v780_v25 }
 0x118   : > { %v2507_v37 = vpop.f32.mrf.mxu3  ;;  %v2690_v54 = vadd.f32 %v2504_v19, %v2171_v35  ;;  %3288 = vmatmul.msk.bf16.gmra.mxu0 %vm975_vm1, %v765_v34  ;;  %v1702_v19 = vrot.slane %v794_v56, 5 }
 0x11a   : > { %v1457_v36 = vpop.f32.mrf.mxu1  ;;  %v2776_v38 = vadd.f32 %v3946_v26, %v2690_v54  ;;  %3381 = vmatmul.msk.bf16.gmra.mxu2 %vm975_vm1, %v1696_v4  ;;  %v1703_v28 = vor.u32 %v1702_v19, %v1701_v17  ;;  %v802_v4 = vshll.u32 %v4173_v20, 16  ;;  %v806_v54 = vshrl.u32 %v4173_v20, 16 }
 0x11c   : > { %2858 = vst [vmem:[%s3958_s12 + $0x68] sm:$0xff] %v2776_v38 }
 0x11d   : > { %v1988_v40 = vpop.f32.mrf.mxu2  ;;  %v1149_v41 = vpop.f32.mrf.mxu0 }
 0x11e   : > { %v2172_v43 = vadd.f32 %v1988_v40, %v1456_v39  ;;  %v1458_v61 = vadd.f32 %v1457_v36, %v1149_v41  ;;  %v2282_v40 = vrot.slane %v4173_v20, 5 }
 0x120   : > { %v2509_v48 = vpop.f32.mrf.mxu3  ;;  %v2691_v53 = vadd.f32 %v2507_v37, %v2172_v43  ;;  %v2283_v52 = vsel %vm2244_vm2, %v2280_v11, %v2282_v40 }
 0x122   : > { %v1460_v47 = vpop.f32.mrf.mxu1  ;;  %v2777_v59 = vadd.f32 %v3946_v26, %v2691_v53  ;;  %v784_v53 = vor.u32 %v782_v49, %v780_v25  ;;  %v4199_v49 = vld [vmem:[%s3828_s8 + $0xb0] sm:$0xff] }
 0x124   : > { %2859 = vst [vmem:[%s3958_s12 + $0x70] sm:$0xff] %v2777_v59 }
 0x125   : > { %3334 = vmatmul.msk.bf16.gmra.mxu1 %vm975_vm1, %v4043_v21  ;;  %3430 = vmatmul.msk.bf16.gmra.mxu3 %vm975_vm1, %v2279_v55  ;;  %v1990_v62 = vpop.f32.mrf.mxu2  ;;  %v1152_v63 = vpop.f32.mrf.mxu0  ;;  %v1700_v21 = vsel %vm1629_vm4, %v1695_v30, %v1699_v60  ;;  %v788_v55 = vrot.slane %v786_v45, 1 }
 0x126   : > { %v2173_v1 = vadd.f32 %v1990_v62, %v1458_v61  ;;  %v1461_v8 = vadd.f32 %v1460_v47, %v1152_v63  ;;  %v1705_v47 = vrot.slane %v806_v54, 4 }
 0x127   : > { %v789_v62 = vsel %vm633_vm3, %v784_v53, %v788_v55 }
 0x128   : > { %v2512_v6 = vpop.f32.mrf.mxu3  ;;  %v2692_v2 = vadd.f32 %v2509_v48, %v2173_v1  ;;  %3289 = vmatmul.msk.bf16.gmra.mxu0 %vm975_vm1, %v773_v0  ;;  %v1706_v48 = vrot.slane %v802_v4, 5 }
 0x12a   : > { %v1462_v5 = vpop.f32.mrf.mxu1  ;;  %v2778_v7 = vadd.f32 %v3946_v26, %v2692_v2  ;;  %3382 = vmatmul.msk.bf16.gmra.mxu2 %vm975_vm1, %v1700_v21  ;;  %v1707_v58 = vor.u32 %v1706_v48, %v1705_v47  ;;  %v810_v21 = vshll.u32 %v4199_v49, 16  ;;  %v814_v2 = vshrl.u32 %v4199_v49, 16 }
 0x12c   : > { %2860 = vst [vmem:[%s3958_s12 + $0x78] sm:$0xff] %v2778_v7 }
 0x12d   : > { %v1993_v9 = vpop.f32.mrf.mxu2  ;;  %v1154_v10 = vpop.f32.mrf.mxu0 }
 0x12e   : > { %v2174_v12 = vadd.f32 %v1993_v9, %v1461_v8  ;;  %v1463_v29 = vadd.f32 %v1462_v5, %v1154_v10  ;;  %v2284_v9 = vrot.slane %v4199_v49, 5 }
 0x130   : > { %v2514_v14 = vpop.f32.mrf.mxu3  ;;  %v2693_v22 = vadd.f32 %v2512_v6, %v2174_v12  ;;  %v2285_v19 = vsel %vm2244_vm2, %v2282_v40, %v2284_v9 }
 0x132   : > { %v1465_v13 = vpop.f32.mrf.mxu1  ;;  %v2779_v27 = vadd.f32 %v3946_v26, %v2693_v22  ;;  %v792_v22 = vor.u32 %v790_v15, %v788_v55  ;;  %v4225_v15 = vld [vmem:[%s3828_s8 + $0xb8] sm:$0xff] }
 0x134   : > { %2861 = vst [vmem:[%s3958_s12 + $0x80] sm:$0xff] %v2779_v27 }
 0x135   : > { %3335 = vmatmul.msk.bf16.gmra.mxu1 %vm975_vm1, %v4069_v50  ;;  %3431 = vmatmul.msk.bf16.gmra.mxu3 %vm975_vm1, %v2281_v23  ;;  %v1995_v30 = vpop.f32.mrf.mxu2  ;;  %v1157_v31 = vpop.f32.mrf.mxu0  ;;  %v1704_v50 = vsel %vm1629_vm4, %v1699_v60, %v1703_v28  ;;  %v796_v23 = vrot.slane %v794_v56, 1 }
 0x136   : > { %v2175_v33 = vadd.f32 %v1995_v30, %v1463_v29  ;;  %v1466_v37 = vadd.f32 %v1465_v13, %v1157_v31  ;;  %v1709_v13 = vrot.slane %v814_v2, 4 }
 0x137   : > { %v797_v30 = vsel %vm633_vm3, %v792_v22, %v796_v23 }
 0x138   : > { %v2517_v35 = vpop.f32.mrf.mxu3  ;;  %v2694_v18 = vadd.f32 %v2514_v14, %v2175_v33  ;;  %3290 = vmatmul.msk.bf16.gmra.mxu0 %vm975_vm1, %v781_v32  ;;  %v1710_v14 = vrot.slane %v810_v21, 5 }
 0x13a   : > { %v1467_v34 = vpop.f32.mrf.mxu1  ;;  %v2780_v36 = vadd.f32 %v3946_v26, %v2694_v18  ;;  %3383 = vmatmul.msk.bf16.gmra.mxu2 %vm975_vm1, %v1704_v50  ;;  %v1711_v25 = vor.u32 %v1710_v14, %v1709_v13  ;;  %v818_v50 = vshll.u32 %v4225_v15, 16  ;;  %v822_v18 = vshrl.u32 %v4225_v15, 16 }
 0x13c   : > { %2862 = vst [vmem:[%s3958_s12 + $0x88] sm:$0xff] %v2780_v36 }
 0x13d   : > { %v1998_v38 = vpop.f32.mrf.mxu2  ;;  %v1159_v39 = vpop.f32.mrf.mxu0 }
 0x13e   : > { %v2176_v41 = vadd.f32 %v1998_v38, %v1466_v37  ;;  %v1468_v59 = vadd.f32 %v1467_v34, %v1159_v39  ;;  %v2286_v38 = vrot.slane %v4225_v15, 5 }
 0x140   : > { %v2519_v43 = vpop.f32.mrf.mxu3  ;;  %v2695_v51 = vadd.f32 %v2517_v35, %v2176_v41  ;;  %v2287_v48 = vsel %vm2244_vm2, %v2284_v9, %v2286_v38 }
 0x142   : > { %v1470_v42 = vpop.f32.mrf.mxu1  ;;  %v2781_v57 = vadd.f32 %v3946_v26, %v2695_v51  ;;  %v800_v51 = vor.u32 %v798_v44, %v796_v23  ;;  %v4251_v44 = vld [vmem:[%s3828_s8 + $0xc0] sm:$0xff] }
 0x144   : > { %2863 = vst [vmem:[%s3958_s12 + $0x90] sm:$0xff] %v2781_v57 }
 0x145   : > { %3336 = vmatmul.msk.bf16.gmra.mxu1 %vm975_vm1, %v4095_v16  ;;  %3432 = vmatmul.msk.bf16.gmra.mxu3 %vm975_vm1, %v2283_v52  ;;  %v2000_v60 = vpop.f32.mrf.mxu2  ;;  %v1162_v61 = vpop.f32.mrf.mxu0  ;;  %v1708_v16 = vsel %vm1629_vm4, %v1703_v28, %v1707_v58  ;;  %v804_v52 = vrot.slane %v802_v4, 1 }
 0x146   : > { %v2177_v63 = vadd.f32 %v2000_v60, %v1468_v59  ;;  %v1471_v6 = vadd.f32 %v1470_v42, %v1162_v61  ;;  %v1713_v42 = vrot.slane %v822_v18, 4 }
 0x147   : > { %v805_v60 = vsel %vm633_vm3, %v800_v51, %v804_v52 }
 0x148   : > { %v2522_v1 = vpop.f32.mrf.mxu3  ;;  %v2696_v45 = vadd.f32 %v2519_v43, %v2177_v63  ;;  %3291 = vmatmul.msk.bf16.gmra.mxu0 %vm975_vm1, %v789_v62  ;;  %v1714_v43 = vrot.slane %v818_v50, 5 }
 0x14a   : > { %v1472_v0 = vpop.f32.mrf.mxu1  ;;  %v2782_v5 = vadd.f32 %v3946_v26, %v2696_v45  ;;  %3384 = vmatmul.msk.bf16.gmra.mxu2 %vm975_vm1, %v1708_v16  ;;  %v1715_v55 = vor.u32 %v1714_v43, %v1713_v42  ;;  %v826_v16 = vshll.u32 %v4251_v44, 16  ;;  %v830_v45 = vshrl.u32 %v4251_v44, 16 }
 0x14c   : > { %2864 = vst [vmem:[%s3958_s12 + $0x98] sm:$0xff] %v2782_v5 }
 0x14d   : > { %v2003_v7 = vpop.f32.mrf.mxu2  ;;  %v1164_v8 = vpop.f32.mrf.mxu0 }
 0x14e   : > { %v2178_v10 = vadd.f32 %v2003_v7, %v1471_v6  ;;  %v1473_v27 = vadd.f32 %v1472_v0, %v1164_v8  ;;  %v2288_v7 = vrot.slane %v4251_v44, 5 }
 0x150   : > { %v2524_v12 = vpop.f32.mrf.mxu3  ;;  %v2697_v17 = vadd.f32 %v2522_v1, %v2178_v10  ;;  %v2289_v14 = vsel %vm2244_vm2, %v2286_v38, %v2288_v7 }
 0x152   : > { %v1475_v11 = vpop.f32.mrf.mxu1  ;;  %v2783_v24 = vadd.f32 %v3946_v26, %v2697_v17  ;;  %v808_v17 = vor.u32 %v806_v54, %v804_v52  ;;  %v4277_v54 = vld [vmem:[%s3828_s8 + $0xc8] sm:$0xff] }
 0x154   : > { %2865 = vst [vmem:[%s3958_s12 + $0xa0] sm:$0xff] %v2783_v24 }
 0x155   : > { %3337 = vmatmul.msk.bf16.gmra.mxu1 %vm975_vm1, %v4121_v46  ;;  %3433 = vmatmul.msk.bf16.gmra.mxu3 %vm975_vm1, %v2285_v19  ;;  %v2005_v28 = vpop.f32.mrf.mxu2  ;;  %v1167_v29 = vpop.f32.mrf.mxu0  ;;  %v1712_v46 = vsel %vm1629_vm4, %v1707_v58, %v1711_v25  ;;  %v812_v19 = vrot.slane %v810_v21, 1 }
 0x156   : > { %v2179_v31 = vadd.f32 %v2005_v28, %v1473_v27  ;;  %v1476_v35 = vadd.f32 %v1475_v11, %v1167_v29  ;;  %v1717_v11 = vrot.slane %v830_v45, 4 }
 0x157   : > { %v813_v28 = vsel %vm633_vm3, %v808_v17, %v812_v19 }
 0x158   : > { %v2527_v33 = vpop.f32.mrf.mxu3  ;;  %v2698_v56 = vadd.f32 %v2524_v12, %v2179_v31  ;;  %3292 = vmatmul.msk.bf16.gmra.mxu0 %vm975_vm1, %v797_v30  ;;  %v1718_v12 = vrot.slane %v826_v16, 5 }
 0x15a   : > { %v1477_v32 = vpop.f32.mrf.mxu1  ;;  %v2784_v34 = vadd.f32 %v3946_v26, %v2698_v56  ;;  %3385 = vmatmul.msk.bf16.gmra.mxu2 %vm975_vm1, %v1712_v46  ;;  %v1719_v23 = vor.u32 %v1718_v12, %v1717_v11  ;;  %v834_v46 = vshll.u32 %v4277_v54, 16  ;;  %v838_v56 = vshrl.u32 %v4277_v54, 16 }
 0x15c   : > { %2866 = vst [vmem:[%s3958_s12 + $0xa8] sm:$0xff] %v2784_v34 }
 0x15d   : > { %v2008_v36 = vpop.f32.mrf.mxu2  ;;  %v1169_v37 = vpop.f32.mrf.mxu0 }
 0x15e   : > { %v2180_v39 = vadd.f32 %v2008_v36, %v1476_v35  ;;  %v1478_v57 = vadd.f32 %v1477_v32, %v1169_v37  ;;  %v2290_v36 = vrot.slane %v4277_v54, 5 }
 0x160   : > { %v2529_v41 = vpop.f32.mrf.mxu3  ;;  %v2699_v47 = vadd.f32 %v2527_v33, %v2180_v39  ;;  %v2291_v43 = vsel %vm2244_vm2, %v2288_v7, %v2290_v36 }
 0x162   : > { %v1480_v40 = vpop.f32.mrf.mxu1  ;;  %v2785_v53 = vadd.f32 %v3946_v26, %v2699_v47  ;;  %v816_v47 = vor.u32 %v814_v2, %v812_v19  ;;  %v4303_v2 = vld [vmem:[%s3828_s8 + $0xd0] sm:$0xff] }
 0x164   : > { %2867 = vst [vmem:[%s3958_s12 + $0xb0] sm:$0xff] %v2785_v53 }
 0x165   : > { %3338 = vmatmul.msk.bf16.gmra.mxu1 %vm975_vm1, %v4147_v3  ;;  %3434 = vmatmul.msk.bf16.gmra.mxu3 %vm975_vm1, %v2287_v48  ;;  %v2010_v58 = vpop.f32.mrf.mxu2  ;;  %v1172_v59 = vpop.f32.mrf.mxu0  ;;  %v1716_v3 = vsel %vm1629_vm4, %v1711_v25, %v1715_v55  ;;  %v820_v48 = vrot.slane %v818_v50, 1 }
 0x166   : > { %v2181_v61 = vadd.f32 %v2010_v58, %v1478_v57  ;;  %v1481_v1 = vadd.f32 %v1480_v40, %v1172_v59  ;;  %v1721_v40 = vrot.slane %v838_v56, 4 }
 0x167   : > { %v821_v58 = vsel %vm633_vm3, %v816_v47, %v820_v48 }
 0x168   : > { %v2532_v63 = vpop.f32.mrf.mxu3  ;;  %v2700_v4 = vadd.f32 %v2529_v41, %v2181_v61  ;;  %3293 = vmatmul.msk.bf16.gmra.mxu0 %vm975_vm1, %v805_v60  ;;  %v1722_v41 = vrot.slane %v834_v46, 5 }
 0x16a   : > { %v1482_v62 = vpop.f32.mrf.mxu1  ;;  %v2786_v0 = vadd.f32 %v3946_v26, %v2700_v4  ;;  %3386 = vmatmul.msk.bf16.gmra.mxu2 %vm975_vm1, %v1716_v3  ;;  %v1723_v52 = vor.u32 %v1722_v41, %v1721_v40  ;;  %v842_v3 = vshll.u32 %v4303_v2, 16  ;;  %v846_v4 = vshrl.u32 %v4303_v2, 16 }
 0x16c   : > { %2868 = vst [vmem:[%s3958_s12 + $0xb8] sm:$0xff] %v2786_v0 }
 0x16d   : > { %v2013_v5 = vpop.f32.mrf.mxu2  ;;  %v1174_v6 = vpop.f32.mrf.mxu0 }
 0x16e   : > { %v2182_v8 = vadd.f32 %v2013_v5, %v1481_v1  ;;  %v1483_v24 = vadd.f32 %v1482_v62, %v1174_v6  ;;  %v2292_v5 = vrot.slane %v4303_v2, 5 }
 0x170   : > { %v2534_v10 = vpop.f32.mrf.mxu3  ;;  %v2701_v13 = vadd.f32 %v2532_v63, %v2182_v8  ;;  %v2293_v12 = vsel %vm2244_vm2, %v2290_v36, %v2292_v5 }
 0x172   : > { %v1485_v9 = vpop.f32.mrf.mxu1  ;;  %v2787_v22 = vadd.f32 %v3946_v26, %v2701_v13  ;;  %v824_v13 = vor.u32 %v822_v18, %v820_v48  ;;  %v4329_v18 = vld [vmem:[%s3828_s8 + $0xd8] sm:$0xff] }
 0x174   : > { %2869 = vst [vmem:[%s3958_s12 + $0xc0] sm:$0xff] %v2787_v22 }
 0x175   : > { %3339 = vmatmul.msk.bf16.gmra.mxu1 %vm975_vm1, %v4173_v20  ;;  %3435 = vmatmul.msk.bf16.gmra.mxu3 %vm975_vm1, %v2289_v14  ;;  %v2015_v25 = vpop.f32.mrf.mxu2  ;;  %v1177_v27 = vpop.f32.mrf.mxu0  ;;  %v1720_v20 = vsel %vm1629_vm4, %v1715_v55, %v1719_v23  ;;  %v828_v14 = vrot.slane %v826_v16, 1 }
 0x176   : > { %v2183_v29 = vadd.f32 %v2015_v25, %v1483_v24  ;;  %v1486_v33 = vadd.f32 %v1485_v9, %v1177_v27  ;;  %v1725_v9 = vrot.slane %v846_v4, 4 }
 0x177   : > { %v829_v25 = vsel %vm633_vm3, %v824_v13, %v828_v14  ;;  %v832_v41 = vor.u32 %v830_v45, %v828_v14 }
 0x178   : > { %v2537_v31 = vpop.f32.mrf.mxu3  ;;  %v2702_v21 = vadd.f32 %v2534_v10, %v2183_v29  ;;  %3294 = vmatmul.msk.bf16.gmra.mxu0 %vm975_vm1, %v813_v28  ;;  %v1726_v10 = vrot.slane %v842_v3, 5 }
 0x17a   : > { %v1487_v30 = vpop.f32.mrf.mxu1  ;;  %v2788_v32 = vadd.f32 %v3946_v26, %v2702_v21  ;;  %3387 = vmatmul.msk.bf16.gmra.mxu2 %vm975_vm1, %v1720_v20  ;;  %v1727_v19 = vor.u32 %v1726_v10, %v1725_v9  ;;  %v850_v20 = vshll.u32 %v4329_v18, 16  ;;  %v854_v21 = vshrl.u32 %v4329_v18, 16 }
 0x17c   : > { %2870 = vst [vmem:[%s3958_s12 + $0xc8] sm:$0xff] %v2788_v32 }
 0x17d   : > { %v2018_v34 = vpop.f32.mrf.mxu2  ;;  %v1179_v35 = vpop.f32.mrf.mxu0 }
 0x17e   : > { %v2184_v37 = vadd.f32 %v2018_v34, %v1486_v33  ;;  %v1488_v53 = vadd.f32 %v1487_v30, %v1179_v35  ;;  %v2294_v34 = vrot.slane %v4329_v18, 5 }
 0x180   : > { %v2539_v39 = vpop.f32.mrf.mxu3  ;;  %v2703_v42 = vadd.f32 %v2537_v31, %v2184_v37  ;;  %v2295_v40 = vsel %vm2244_vm2, %v2292_v5, %v2294_v34 }
 0x182   : > { %v1490_v38 = vpop.f32.mrf.mxu1  ;;  %v2789_v51 = vadd.f32 %v3946_v26, %v2703_v42  ;;  %v836_v42 = vrot.slane %v834_v46, 1 }
 0x184   : > { %2871 = vst [vmem:[%s3958_s12 + $0xd0] sm:$0xff] %v2789_v51  ;;  %v837_v45 = vsel %vm633_vm3, %v832_v41, %v836_v42 }
 0x185   : > { %3340 = vmatmul.msk.bf16.gmra.mxu1 %vm975_vm1, %v4199_v49  ;;  %3436 = vmatmul.msk.bf16.gmra.mxu3 %vm975_vm1, %v2291_v43  ;;  %v2020_v55 = vpop.f32.mrf.mxu2  ;;  %v1182_v57 = vpop.f32.mrf.mxu0  ;;  %v1724_v49 = vsel %vm1629_vm4, %v1719_v23, %v1723_v52  ;;  %v4352_v43 = vld [vmem:[%s4857_s3] ss:$0 sm:$0xff] }
 0x186   : > { %v2185_v59 = vadd.f32 %v2020_v55, %v1488_v53  ;;  %v1491_v63 = vadd.f32 %v1490_v38, %v1182_v57  ;;  %v1729_v38 = vrot.slane %v854_v21, 4 }
 0x188   : > { %v2542_v61 = vpop.f32.mrf.mxu3  ;;  %v2704_v50 = vadd.f32 %v2539_v39, %v2185_v59  ;;  %3295 = vmatmul.msk.bf16.gmra.mxu0 %vm975_vm1, %v821_v58  ;;  %v4360_v58 = vld [vmem:[%s3828_s8 + $0xe0] sm:$0xff] }
 0x18a   : > { %v1492_v60 = vpop.f32.mrf.mxu1  ;;  %v2790_v62 = vadd.f32 %v3946_v26, %v2704_v50  ;;  %3388 = vmatmul.msk.bf16.gmra.mxu2 %vm975_vm1, %v1724_v49  ;;  %v858_v49 = vshll.u32 %v4360_v58, 16  ;;  %v862_v50 = vshrl.u32 %v4360_v58, 16 }
 0x18c   : > { %2872 = vst [vmem:[%s3958_s12 + $0xd8] sm:$0xff] %v2790_v62 }
 0x18d   : > { %v2023_v0 = vpop.f32.mrf.mxu2  ;;  %v1184_v1 = vpop.f32.mrf.mxu0 }
 0x18e   : > { %v2186_v6 = vadd.f32 %v2023_v0, %v1491_v63  ;;  %v1493_v22 = vadd.f32 %v1492_v60, %v1184_v1  ;;  %v2296_v0 = vrot.slane %v4360_v58, 5 }
 0x190   : > { %v2544_v8 = vpop.f32.mrf.mxu3  ;;  %v2705_v11 = vadd.f32 %v2542_v61, %v2186_v6  ;;  %v2297_v10 = vsel %vm2244_vm2, %v2294_v34, %v2296_v0 }
 0x192   : > { %v1495_v7 = vpop.f32.mrf.mxu1  ;;  %v2791_v17 = vadd.f32 %v3946_v26, %v2705_v11  ;;  %v840_v11 = vor.u32 %v838_v56, %v836_v42  ;;  %v4386_v56 = vld [vmem:[%s3828_s8 + $0xe8] sm:$0xff] }
 0x194   : > { %2873 = vst [vmem:[%s3958_s12 + $0xe0] sm:$0xff] %v2791_v17 }
 0x195   : > { %3341 = vmatmul.msk.bf16.gmra.mxu1 %vm975_vm1, %v4225_v15  ;;  %3437 = vmatmul.msk.bf16.gmra.mxu3 %vm975_vm1, %v2293_v12  ;;  %v2025_v23 = vpop.f32.mrf.mxu2  ;;  %v1187_v24 = vpop.f32.mrf.mxu0  ;;  %v1728_v15 = vsel %vm1629_vm4, %v1723_v52, %v1727_v19  ;;  %v844_v12 = vrot.slane %v842_v3, 1 }
 0x196   : > { %v2187_v27 = vadd.f32 %v2025_v23, %v1493_v22  ;;  %v1496_v31 = vadd.f32 %v1495_v7, %v1187_v24  ;;  %v1733_v7 = vrot.slane %v862_v50, 4 }
 0x197   : > { %v845_v23 = vsel %vm633_vm3, %v840_v11, %v844_v12 }
 0x198   : > { %v2547_v29 = vpop.f32.mrf.mxu3  ;;  %v2706_v16 = vadd.f32 %v2544_v8, %v2187_v27  ;;  %3296 = vmatmul.msk.bf16.gmra.mxu0 %vm975_vm1, %v829_v25  ;;  %v1734_v8 = vrot.slane %v858_v49, 5 }
 0x19a   : > { %v1497_v28 = vpop.f32.mrf.mxu1  ;;  %v2792_v30 = vadd.f32 %v3946_v26, %v2706_v16  ;;  %3389 = vmatmul.msk.bf16.gmra.mxu2 %vm975_vm1, %v1728_v15  ;;  %v1730_v26 = vrot.slane %v850_v20, 5  ;;  %v1735_v14 = vor.u32 %v1734_v8, %v1733_v7  ;;  %v866_v15 = vshll.u32 %v4386_v56, 16 }
 0x19b   : > { %v870_v16 = vshrl.u32 %v4386_v56, 16 }
 0x19c   : > { %2874 = vst [vmem:[%s3958_s12 + $0xe8] sm:$0xff] %v2792_v30  ;;  %v1731_v48 = vor.u32 %v1730_v26, %v1729_v38 }
 0x19d   : > { %v2028_v32 = vpop.f32.mrf.mxu2  ;;  %v1189_v33 = vpop.f32.mrf.mxu0 }
 0x19e   : > { %v2188_v35 = vadd.f32 %v2028_v32, %v1496_v31  ;;  %v1498_v51 = vadd.f32 %v1497_v28, %v1189_v33  ;;  %v1732_v57 = vsel %vm1629_vm4, %v1727_v19, %v1731_v48  ;;  %v2298_v32 = vrot.slane %v4386_v56, 5 }
 0x1a0   : > { %v2549_v37 = vpop.f32.mrf.mxu3  ;;  %v2707_v39 = vadd.f32 %v2547_v29, %v2188_v35  ;;  %v2299_v26 = vsel %vm2244_vm2, %v2296_v0, %v2298_v32 }
 0x1a2   : > { %v1500_v36 = vpop.f32.mrf.mxu1  ;;  %v2793_v47 = vadd.f32 %v4352_v43, %v2707_v39  ;;  %v848_v39 = vor.u32 %v846_v4, %v844_v12  ;;  %v4412_v4 = vld [vmem:[%s3828_s8 + $0xf0] sm:$0xff] }
 0x1a4   : > { %2875 = vst [vmem:[%s3958_s12 + $0xf0] sm:$0xff] %v2793_v47 }
 0x1a5   : > { %3342 = vmatmul.msk.bf16.gmra.mxu1 %vm975_vm1, %v4251_v44  ;;  %3438 = vmatmul.msk.bf16.gmra.mxu3 %vm975_vm1, %v2295_v40  ;;  %v2030_v52 = vpop.f32.mrf.mxu2  ;;  %v1192_v44 = vpop.f32.mrf.mxu0  ;;  %v852_v40 = vrot.slane %v850_v20, 1 }
 0x1a6   : > { %v2189_v53 = vadd.f32 %v2030_v52, %v1498_v51  ;;  %v1501_v61 = vadd.f32 %v1500_v36, %v1192_v44  ;;  %v1737_v36 = vrot.slane %v870_v16, 4 }
 0x1a7   : > { %v853_v52 = vsel %vm633_vm3, %v848_v39, %v852_v40 }
 0x1a8   : > { %v2552_v46 = vpop.f32.mrf.mxu3  ;;  %v2708_v59 = vadd.f32 %v2549_v37, %v2189_v53  ;;  %3297 = vmatmul.msk.bf16.gmra.mxu0 %vm975_vm1, %v837_v45  ;;  %v1738_v37 = vrot.slane %v866_v15, 5 }
 0x1aa   : > { %v1502_v55 = vpop.f32.mrf.mxu1  ;;  %v2794_v60 = vadd.f32 %v4352_v43, %v2708_v59  ;;  %3390 = vmatmul.msk.bf16.gmra.mxu2 %vm975_vm1, %v1732_v57  ;;  %v1739_v42 = vor.u32 %v1738_v37, %v1737_v36  ;;  %v874_v57 = vshll.u32 %v4412_v4, 16  ;;  %v878_v59 = vshrl.u32 %v4412_v4, 16 }
 0x1ac   : > { %2876 = vst [vmem:[%s3958_s12 + $0xf8] sm:$0xff] %v2794_v60 }
 0x1ad   : > { %v2033_v62 = vpop.f32.mrf.mxu2  ;;  %v1194_v63 = vpop.f32.mrf.mxu0 }
 0x1ae   : > { %v2190_v1 = vadd.f32 %v2033_v62, %v1501_v61  ;;  %v1503_v17 = vadd.f32 %v1502_v55, %v1194_v63  ;;  %v2300_v62 = vrot.slane %v4412_v4, 5 }
 0x1b0   : > { %v2554_v6 = vpop.f32.mrf.mxu3  ;;  %v2709_v9 = vadd.f32 %v2552_v46, %v2190_v1  ;;  %v2301_v8 = vsel %vm2244_vm2, %v2298_v32, %v2300_v62 }
 0x1b2   : > { %v1505_v5 = vpop.f32.mrf.mxu1  ;;  %v2795_v13 = vadd.f32 %v4352_v43, %v2709_v9  ;;  %v856_v9 = vor.u32 %v854_v21, %v852_v40  ;;  %v4438_v21 = vld [vmem:[%s3828_s8 + $0xf8] sm:$0xff] }
 0x1b4   : > { %2877 = vst [vmem:[%s3958_s12 + $0x100] sm:$0xff] %v2795_v13 }
 0x1b5   : > { %3343 = vmatmul.msk.bf16.gmra.mxu1 %vm975_vm1, %v4277_v54  ;;  %3439 = vmatmul.msk.bf16.gmra.mxu3 %vm975_vm1, %v2297_v10  ;;  %v2035_v19 = vpop.f32.mrf.mxu2  ;;  %v1197_v22 = vpop.f32.mrf.mxu0  ;;  %v1736_v54 = vsel %vm1629_vm4, %v1731_v48, %v1735_v14  ;;  %v860_v10 = vrot.slane %v858_v49, 1 }
 0x1b6   : > { %v2191_v24 = vadd.f32 %v2035_v19, %v1503_v17  ;;  %v1506_v29 = vadd.f32 %v1505_v5, %v1197_v22  ;;  %v1741_v5 = vrot.slane %v878_v59, 4 }
 0x1b7   : > { %v861_v19 = vsel %vm633_vm3, %v856_v9, %v860_v10 }
 0x1b8   : > { %v2557_v27 = vpop.f32.mrf.mxu3  ;;  %v2710_v3 = vadd.f32 %v2554_v6, %v2191_v24  ;;  %3298 = vmatmul.msk.bf16.gmra.mxu0 %vm975_vm1, %v845_v23  ;;  %v1742_v6 = vrot.slane %v874_v57, 5 }
 0x1ba   : > { %v1507_v25 = vpop.f32.mrf.mxu1  ;;  %v2796_v28 = vadd.f32 %v4352_v43, %v2710_v3  ;;  %3391 = vmatmul.msk.bf16.gmra.mxu2 %vm975_vm1, %v1736_v54  ;;  %v1743_v12 = vor.u32 %v1742_v6, %v1741_v5  ;;  %v882_v54 = vshll.u32 %v4438_v21, 16  ;;  %v886_v3 = vshrl.u32 %v4438_v21, 16 }
 0x1bc   : > { %2878 = vst [vmem:[%s3958_s12 + $0x108] sm:$0xff] %v2796_v28 }
 0x1bd   : > { %v2038_v30 = vpop.f32.mrf.mxu2  ;;  %v1199_v31 = vpop.f32.mrf.mxu0 }
 0x1be   : > { %v2192_v33 = vadd.f32 %v2038_v30, %v1506_v29  ;;  %v1508_v47 = vadd.f32 %v1507_v25, %v1199_v31  ;;  %v2302_v30 = vrot.slane %v4438_v21, 5 }
 0x1c0   : > { %v2559_v35 = vpop.f32.mrf.mxu3  ;;  %v2711_v38 = vadd.f32 %v2557_v27, %v2192_v33  ;;  %v2303_v37 = vsel %vm2244_vm2, %v2300_v62, %v2302_v30 }
 0x1c2   : > { %v1510_v34 = vpop.f32.mrf.mxu1  ;;  %v2797_v41 = vadd.f32 %v4352_v43, %v2711_v38  ;;  %v864_v38 = vor.u32 %v862_v50, %v860_v10  ;;  %v4464_v50 = vld [vmem:[%s3828_s8 + $0x100] sm:$0xff] }
 0x1c4   : > { %2879 = vst [vmem:[%s3958_s12 + $0x110] sm:$0xff] %v2797_v41 }
 0x1c5   : > { %3344 = vmatmul.msk.bf16.gmra.mxu1 %vm975_vm1, %v4303_v2  ;;  %3440 = vmatmul.msk.bf16.gmra.mxu3 %vm975_vm1, %v2299_v26  ;;  %v2040_v48 = vpop.f32.mrf.mxu2  ;;  %v1202_v51 = vpop.f32.mrf.mxu0  ;;  %v1740_v2 = vsel %vm1629_vm4, %v1735_v14, %v1739_v42  ;;  %v868_v26 = vrot.slane %v866_v15, 1 }
 0x1c6   : > { %v2193_v44 = vadd.f32 %v2040_v48, %v1508_v47  ;;  %v1511_v46 = vadd.f32 %v1510_v34, %v1202_v51  ;;  %v1745_v34 = vrot.slane %v886_v3, 4 }
 0x1c7   : > { %v869_v48 = vsel %vm633_vm3, %v864_v38, %v868_v26 }
 0x1c8   : > { %v2562_v53 = vpop.f32.mrf.mxu3  ;;  %v2712_v20 = vadd.f32 %v2559_v35, %v2193_v44  ;;  %3299 = vmatmul.msk.bf16.gmra.mxu0 %vm975_vm1, %v853_v52  ;;  %v1746_v35 = vrot.slane %v882_v54, 5 }
 0x1ca   : > { %v1512_v45 = vpop.f32.mrf.mxu1  ;;  %v2798_v55 = vadd.f32 %v4352_v43, %v2712_v20  ;;  %3392 = vmatmul.msk.bf16.gmra.mxu2 %vm975_vm1, %v1740_v2  ;;  %v1747_v40 = vor.u32 %v1746_v35, %v1745_v34  ;;  %v890_v2 = vshll.u32 %v4464_v50, 16  ;;  %v894_v20 = vshrl.u32 %v4464_v50, 16 }
 0x1cc   : > { %2880 = vst [vmem:[%s3958_s12 + $0x118] sm:$0xff] %v2798_v55 }
 0x1cd   : > { %v2043_v60 = vpop.f32.mrf.mxu2  ;;  %v1204_v61 = vpop.f32.mrf.mxu0 }
 0x1ce   : > { %v2194_v63 = vadd.f32 %v2043_v60, %v1511_v46  ;;  %v1513_v13 = vadd.f32 %v1512_v45, %v1204_v61  ;;  %v2304_v60 = vrot.slane %v4464_v50, 5 }
 0x1d0   : > { %v2564_v1 = vpop.f32.mrf.mxu3  ;;  %v2713_v7 = vadd.f32 %v2562_v53, %v2194_v63  ;;  %v2305_v6 = vsel %vm2244_vm2, %v2302_v30, %v2304_v60 }
 0x1d2   : > { %v1515_v0 = vpop.f32.mrf.mxu1  ;;  %v2799_v11 = vadd.f32 %v4352_v43, %v2713_v7  ;;  %v872_v7 = vor.u32 %v870_v16, %v868_v26  ;;  %v4490_v16 = vld [vmem:[%s3828_s8 + $0x108] sm:$0xff] }
 0x1d4   : > { %2881 = vst [vmem:[%s3958_s12 + $0x120] sm:$0xff] %v2799_v11 }
 0x1d5   : > { %3345 = vmatmul.msk.bf16.gmra.mxu1 %vm975_vm1, %v4329_v18  ;;  %3441 = vmatmul.msk.bf16.gmra.mxu3 %vm975_vm1, %v2301_v8  ;;  %v2045_v14 = vpop.f32.mrf.mxu2  ;;  %v1207_v17 = vpop.f32.mrf.mxu0  ;;  %v1744_v18 = vsel %vm1629_vm4, %v1739_v42, %v1743_v12  ;;  %v876_v8 = vrot.slane %v874_v57, 1 }
 0x1d6   : > { %v2195_v22 = vadd.f32 %v2045_v14, %v1513_v13  ;;  %v1516_v27 = vadd.f32 %v1515_v0, %v1207_v17  ;;  %v1749_v0 = vrot.slane %v894_v20, 4 }
 0x1d7   : > { %v877_v14 = vsel %vm633_vm3, %v872_v7, %v876_v8 }
 0x1d8   : > { %v2567_v24 = vpop.f32.mrf.mxu3  ;;  %v2714_v49 = vadd.f32 %v2564_v1, %v2195_v22  ;;  %3300 = vmatmul.msk.bf16.gmra.mxu0 %vm975_vm1, %v861_v19  ;;  %v1750_v1 = vrot.slane %v890_v2, 5 }
 0x1da   : > { %v1517_v23 = vpop.f32.mrf.mxu1  ;;  %v2800_v25 = vadd.f32 %v4352_v43, %v2714_v49  ;;  %3393 = vmatmul.msk.bf16.gmra.mxu2 %vm975_vm1, %v1744_v18  ;;  %v1751_v10 = vor.u32 %v1750_v1, %v1749_v0  ;;  %v898_v18 = vshll.u32 %v4490_v16, 16  ;;  %v902_v49 = vshrl.u32 %v4490_v16, 16 }
 0x1dc   : > { %2882 = vst [vmem:[%s3958_s12 + $0x128] sm:$0xff] %v2800_v25 }
 0x1dd   : > { %v2048_v28 = vpop.f32.mrf.mxu2  ;;  %v1209_v29 = vpop.f32.mrf.mxu0 }
 0x1de   : > { %v2196_v31 = vadd.f32 %v2048_v28, %v1516_v27  ;;  %v1518_v41 = vadd.f32 %v1517_v23, %v1209_v29  ;;  %v2306_v28 = vrot.slane %v4490_v16, 5 }
 0x1e0   : > { %v2569_v33 = vpop.f32.mrf.mxu3  ;;  %v2715_v36 = vadd.f32 %v2567_v24, %v2196_v31  ;;  %v2307_v35 = vsel %vm2244_vm2, %v2304_v60, %v2306_v28 }
 0x1e2   : > { %v1520_v32 = vpop.f32.mrf.mxu1  ;;  %v2801_v39 = vadd.f32 %v4352_v43, %v2715_v36  ;;  %v880_v36 = vor.u32 %v878_v59, %v876_v8  ;;  %v4516_v59 = vld [vmem:[%s3828_s8 + $0x110] sm:$0xff] }
 0x1e4   : > { %2883 = vst [vmem:[%s3958_s12 + $0x130] sm:$0xff] %v2801_v39 }
 0x1e5   : > { %3346 = vmatmul.msk.bf16.gmra.mxu1 %vm975_vm1, %v4360_v58  ;;  %3442 = vmatmul.msk.bf16.gmra.mxu3 %vm975_vm1, %v2303_v37  ;;  %v2050_v42 = vpop.f32.mrf.mxu2  ;;  %v1212_v47 = vpop.f32.mrf.mxu0  ;;  %v1748_v58 = vsel %vm1629_vm4, %v1743_v12, %v1747_v40  ;;  %v884_v37 = vrot.slane %v882_v54, 1 }
 0x1e6   : > { %v2197_v51 = vadd.f32 %v2050_v42, %v1518_v41  ;;  %v1521_v53 = vadd.f32 %v1520_v32, %v1212_v47  ;;  %v1753_v32 = vrot.slane %v902_v49, 4 }
 0x1e7   : > { %v885_v42 = vsel %vm633_vm3, %v880_v36, %v884_v37 }
 0x1e8   : > { %v2572_v44 = vpop.f32.mrf.mxu3  ;;  %v2716_v15 = vadd.f32 %v2569_v33, %v2197_v51  ;;  %3301 = vmatmul.msk.bf16.gmra.mxu0 %vm975_vm1, %v869_v48  ;;  %v1754_v33 = vrot.slane %v898_v18, 5 }
 0x1ea   : > { %v1522_v52 = vpop.f32.mrf.mxu1  ;;  %v2802_v45 = vadd.f32 %v4352_v43, %v2716_v15  ;;  %3394 = vmatmul.msk.bf16.gmra.mxu2 %vm975_vm1, %v1748_v58  ;;  %v1755_v26 = vor.u32 %v1754_v33, %v1753_v32  ;;  %v906_v58 = vshll.u32 %v4516_v59, 16  ;;  %v910_v15 = vshrl.u32 %v4516_v59, 16 }
 0x1ec   : > { %2884 = vst [vmem:[%s3958_s12 + $0x138] sm:$0xff] %v2802_v45 }
 0x1ed   : > { %v2053_v55 = vpop.f32.mrf.mxu2  ;;  %v1214_v46 = vpop.f32.mrf.mxu0 }
 0x1ee   : > { %v2198_v61 = vadd.f32 %v2053_v55, %v1521_v53  ;;  %v1523_v11 = vadd.f32 %v1522_v52, %v1214_v46  ;;  %v2308_v55 = vrot.slane %v4516_v59, 5 }
 0x1f0   : > { %v2574_v63 = vpop.f32.mrf.mxu3  ;;  %v2717_v5 = vadd.f32 %v2572_v44, %v2198_v61  ;;  %v2309_v1 = vsel %vm2244_vm2, %v2306_v28, %v2308_v55 }
 0x1f2   : > { %v1525_v62 = vpop.f32.mrf.mxu1  ;;  %v2803_v9 = vadd.f32 %v4352_v43, %v2717_v5  ;;  %v888_v5 = vor.u32 %v886_v3, %v884_v37  ;;  %v4542_v3 = vld [vmem:[%s3828_s8 + $0x118] sm:$0xff] }
 0x1f4   : > { %2885 = vst [vmem:[%s3958_s12 + $0x140] sm:$0xff] %v2803_v9 }
 0x1f5   : > { %3347 = vmatmul.msk.bf16.gmra.mxu1 %vm975_vm1, %v4386_v56  ;;  %3443 = vmatmul.msk.bf16.gmra.mxu3 %vm975_vm1, %v2305_v6  ;;  %v2055_v12 = vpop.f32.mrf.mxu2  ;;  %v1217_v13 = vpop.f32.mrf.mxu0  ;;  %v1752_v56 = vsel %vm1629_vm4, %v1747_v40, %v1751_v10  ;;  %v892_v6 = vrot.slane %v890_v2, 1 }
 0x1f6   : > { %v2199_v17 = vadd.f32 %v2055_v12, %v1523_v11  ;;  %v1526_v24 = vadd.f32 %v1525_v62, %v1217_v13  ;;  %v1757_v62 = vrot.slane %v910_v15, 4 }
 0x1f7   : > { %v893_v12 = vsel %vm633_vm3, %v888_v5, %v892_v6 }
 0x1f8   : > { %v2577_v22 = vpop.f32.mrf.mxu3  ;;  %v2718_v57 = vadd.f32 %v2574_v63, %v2199_v17  ;;  %3302 = vmatmul.msk.bf16.gmra.mxu0 %vm975_vm1, %v877_v14  ;;  %v1758_v63 = vrot.slane %v906_v58, 5 }
 0x1fa   : > { %v1527_v19 = vpop.f32.mrf.mxu1  ;;  %v2804_v23 = vadd.f32 %v4352_v43, %v2718_v57  ;;  %3395 = vmatmul.msk.bf16.gmra.mxu2 %vm975_vm1, %v1752_v56  ;;  %v1759_v8 = vor.u32 %v1758_v63, %v1757_v62  ;;  %v914_v56 = vshll.u32 %v4542_v3, 16  ;;  %v918_v57 = vshrl.u32 %v4542_v3, 16 }
 0x1fc   : > { %2886 = vst [vmem:[%s3958_s12 + $0x148] sm:$0xff] %v2804_v23 }
 0x1fd   : > { %v2058_v25 = vpop.f32.mrf.mxu2  ;;  %v1219_v27 = vpop.f32.mrf.mxu0 }
 0x1fe   : > { %v2200_v29 = vadd.f32 %v2058_v25, %v1526_v24  ;;  %v1528_v39 = vadd.f32 %v1527_v19, %v1219_v27  ;;  %v2310_v25 = vrot.slane %v4542_v3, 5 }
 0x200   : > { %v2579_v31 = vpop.f32.mrf.mxu3  ;;  %v2719_v34 = vadd.f32 %v2577_v22, %v2200_v29  ;;  %v2311_v33 = vsel %vm2244_vm2, %v2308_v55, %v2310_v25 }
 0x202   : > { %v1530_v30 = vpop.f32.mrf.mxu1  ;;  %v2805_v38 = vadd.f32 %v4352_v43, %v2719_v34  ;;  %v896_v34 = vor.u32 %v894_v20, %v892_v6  ;;  %v4568_v20 = vld [vmem:[%s3828_s8 + $0x120] sm:$0xff] }
 0x204   : > { %2887 = vst [vmem:[%s3958_s12 + $0x150] sm:$0xff] %v2805_v38 }
 0x205   : > { %3348 = vmatmul.msk.bf16.gmra.mxu1 %vm975_vm1, %v4412_v4  ;;  %3444 = vmatmul.msk.bf16.gmra.mxu3 %vm975_vm1, %v2307_v35  ;;  %v2060_v40 = vpop.f32.mrf.mxu2  ;;  %v1222_v41 = vpop.f32.mrf.mxu0  ;;  %v1756_v4 = vsel %vm1629_vm4, %v1751_v10, %v1755_v26  ;;  %v900_v35 = vrot.slane %v898_v18, 1 }
 0x206   : > { %v2201_v47 = vadd.f32 %v2060_v40, %v1528_v39  ;;  %v1531_v44 = vadd.f32 %v1530_v30, %v1222_v41  ;;  %v1761_v30 = vrot.slane %v918_v57, 4 }
 0x207   : > { %v901_v40 = vsel %vm633_vm3, %v896_v34, %v900_v35 }
 0x208   : > { %v2582_v51 = vpop.f32.mrf.mxu3  ;;  %v2720_v54 = vadd.f32 %v2579_v31, %v2201_v47  ;;  %3303 = vmatmul.msk.bf16.gmra.mxu0 %vm975_vm1, %v885_v42  ;;  %v1762_v31 = vrot.slane %v914_v56, 5 }
 0x20a   : > { %v1532_v48 = vpop.f32.mrf.mxu1  ;;  %v2806_v52 = vadd.f32 %v4352_v43, %v2720_v54  ;;  %3396 = vmatmul.msk.bf16.gmra.mxu2 %vm975_vm1, %v1756_v4  ;;  %v1763_v37 = vor.u32 %v1762_v31, %v1761_v30  ;;  %v922_v4 = vshll.u32 %v4568_v20, 16  ;;  %v926_v54 = vshrl.u32 %v4568_v20, 16 }
 0x20c   : > { %2888 = vst [vmem:[%s3958_s12 + $0x158] sm:$0xff] %v2806_v52 }
 0x20d   : > { %v2063_v45 = vpop.f32.mrf.mxu2  ;;  %v1224_v53 = vpop.f32.mrf.mxu0 }
 0x20e   : > { %v2202_v46 = vadd.f32 %v2063_v45, %v1531_v44  ;;  %v1533_v9 = vadd.f32 %v1532_v48, %v1224_v53  ;;  %v2312_v45 = vrot.slane %v4568_v20, 5 }
 0x210   : > { %v2584_v61 = vpop.f32.mrf.mxu3  ;;  %v2721_v0 = vadd.f32 %v2582_v51, %v2202_v46  ;;  %v2313_v63 = vsel %vm2244_vm2, %v2310_v25, %v2312_v45 }
 0x212   : > { %v1535_v60 = vpop.f32.mrf.mxu1  ;;  %v2807_v7 = vadd.f32 %v4352_v43, %v2721_v0  ;;  %v904_v0 = vor.u32 %v902_v49, %v900_v35  ;;  %v4594_v49 = vld [vmem:[%s3828_s8 + $0x128] sm:$0xff] }
 0x214   : > { %2889 = vst [vmem:[%s3958_s12 + $0x160] sm:$0xff] %v2807_v7 }
 0x215   : > { %3349 = vmatmul.msk.bf16.gmra.mxu1 %vm975_vm1, %v4438_v21  ;;  %3445 = vmatmul.msk.bf16.gmra.mxu3 %vm975_vm1, %v2309_v1  ;;  %v2065_v10 = vpop.f32.mrf.mxu2  ;;  %v1227_v11 = vpop.f32.mrf.mxu0  ;;  %v1760_v21 = vsel %vm1629_vm4, %v1755_v26, %v1759_v8  ;;  %v908_v1 = vrot.slane %v906_v58, 1 }
 0x216   : > { %v2203_v13 = vadd.f32 %v2065_v10, %v1533_v9  ;;  %v1536_v22 = vadd.f32 %v1535_v60, %v1227_v11  ;;  %v1765_v60 = vrot.slane %v926_v54, 4 }
 0x217   : > { %v909_v10 = vsel %vm633_vm3, %v904_v0, %v908_v1 }
 0x218   : > { %v2587_v17 = vpop.f32.mrf.mxu3  ;;  %v2722_v2 = vadd.f32 %v2584_v61, %v2203_v13  ;;  %3304 = vmatmul.msk.bf16.gmra.mxu0 %vm975_vm1, %v893_v12  ;;  %v1766_v61 = vrot.slane %v922_v4, 5 }
 0x21a   : > { %v1537_v14 = vpop.f32.mrf.mxu1  ;;  %v2808_v19 = vadd.f32 %v4352_v43, %v2722_v2  ;;  %3397 = vmatmul.msk.bf16.gmra.mxu2 %vm975_vm1, %v1760_v21  ;;  %v1767_v6 = vor.u32 %v1766_v61, %v1765_v60  ;;  %v930_v21 = vshll.u32 %v4594_v49, 16  ;;  %v934_v2 = vshrl.u32 %v4594_v49, 16 }
 0x21c   : > { %2890 = vst [vmem:[%s3958_s12 + $0x168] sm:$0xff] %v2808_v19 }
 0x21d   : > { %v2068_v23 = vpop.f32.mrf.mxu2  ;;  %v1229_v24 = vpop.f32.mrf.mxu0 }
 0x21e   : > { %v2204_v27 = vadd.f32 %v2068_v23, %v1536_v22  ;;  %v1538_v38 = vadd.f32 %v1537_v14, %v1229_v24  ;;  %v2314_v23 = vrot.slane %v4594_v49, 5 }
 0x220   : > { %v2589_v29 = vpop.f32.mrf.mxu3  ;;  %v2723_v32 = vadd.f32 %v2587_v17, %v2204_v27  ;;  %v2315_v31 = vsel %vm2244_vm2, %v2312_v45, %v2314_v23 }
 0x222   : > { %v1540_v28 = vpop.f32.mrf.mxu1  ;;  %v2809_v36 = vadd.f32 %v4352_v43, %v2723_v32  ;;  %v912_v32 = vor.u32 %v910_v15, %v908_v1  ;;  %v4620_v15 = vld [vmem:[%s3828_s8 + $0x130] sm:$0xff] }
 0x224   : > { %2891 = vst [vmem:[%s3958_s12 + $0x170] sm:$0xff] %v2809_v36 }
 0x225   : > { %3350 = vmatmul.msk.bf16.gmra.mxu1 %vm975_vm1, %v4464_v50  ;;  %3446 = vmatmul.msk.bf16.gmra.mxu3 %vm975_vm1, %v2311_v33  ;;  %v2070_v26 = vpop.f32.mrf.mxu2  ;;  %v1232_v39 = vpop.f32.mrf.mxu0  ;;  %v1764_v50 = vsel %vm1629_vm4, %v1759_v8, %v1763_v37  ;;  %v916_v33 = vrot.slane %v914_v56, 1 }
 0x226   : > { %v2205_v41 = vadd.f32 %v2070_v26, %v1538_v38  ;;  %v1541_v51 = vadd.f32 %v1540_v28, %v1232_v39  ;;  %v1769_v28 = vrot.slane %v934_v2, 4 }
 0x227   : > { %v917_v26 = vsel %vm633_vm3, %v912_v32, %v916_v33 }
 0x228   : > { %v2592_v47 = vpop.f32.mrf.mxu3  ;;  %v2724_v18 = vadd.f32 %v2589_v29, %v2205_v41  ;;  %3305 = vmatmul.msk.bf16.gmra.mxu0 %vm975_vm1, %v901_v40  ;;  %v1770_v29 = vrot.slane %v930_v21, 5 }
 0x22a   : > { %v1542_v42 = vpop.f32.mrf.mxu1  ;;  %v2810_v48 = vadd.f32 %v4352_v43, %v2724_v18  ;;  %3398 = vmatmul.msk.bf16.gmra.mxu2 %vm975_vm1, %v1764_v50  ;;  %v1771_v35 = vor.u32 %v1770_v29, %v1769_v28  ;;  %v938_v50 = vshll.u32 %v4620_v15, 16  ;;  %v942_v18 = vshrl.u32 %v4620_v15, 16 }
 0x22c   : > { %2892 = vst [vmem:[%s3958_s12 + $0x178] sm:$0xff] %v2810_v48 }
 0x22d   : > { %v2073_v52 = vpop.f32.mrf.mxu2  ;;  %v1234_v44 = vpop.f32.mrf.mxu0 }
 0x22e   : > { %v2206_v53 = vadd.f32 %v2073_v52, %v1541_v51  ;;  %v1543_v7 = vadd.f32 %v1542_v42, %v1234_v44  ;;  %v2316_v52 = vrot.slane %v4620_v15, 5 }
 0x230   : > { %v2594_v46 = vpop.f32.mrf.mxu3  ;;  %v2725_v62 = vadd.f32 %v2592_v47, %v2206_v53  ;;  %v2317_v61 = vsel %vm2244_vm2, %v2314_v23, %v2316_v52 }
 0x232   : > { %v1545_v55 = vpop.f32.mrf.mxu1  ;;  %v2811_v5 = vadd.f32 %v4352_v43, %v2725_v62  ;;  %v920_v62 = vor.u32 %v918_v57, %v916_v33  ;;  %v4646_v57 = vld [vmem:[%s3828_s8 + $0x138] sm:$0xff] }
 0x234   : > { %2893 = vst [vmem:[%s3958_s12 + $0x180] sm:$0xff] %v2811_v5 }
 0x235   : > { %3351 = vmatmul.msk.bf16.gmra.mxu1 %vm975_vm1, %v4490_v16  ;;  %3447 = vmatmul.msk.bf16.gmra.mxu3 %vm975_vm1, %v2313_v63  ;;  %v2075_v8 = vpop.f32.mrf.mxu2  ;;  %v1237_v9 = vpop.f32.mrf.mxu0  ;;  %v1768_v16 = vsel %vm1629_vm4, %v1763_v37, %v1767_v6  ;;  %v924_v63 = vrot.slane %v922_v4, 1 }
 0x236   : > { %v2207_v11 = vadd.f32 %v2075_v8, %v1543_v7  ;;  %v1546_v17 = vadd.f32 %v1545_v55, %v1237_v9  ;;  %v1773_v55 = vrot.slane %v942_v18, 4 }
 0x237   : > { %v925_v8 = vsel %vm633_vm3, %v920_v62, %v924_v63 }
 0x238   : > { %v2597_v13 = vpop.f32.mrf.mxu3  ;;  %v2726_v58 = vadd.f32 %v2594_v46, %v2207_v11  ;;  %3306 = vmatmul.msk.bf16.gmra.mxu0 %vm975_vm1, %v909_v10  ;;  %v1774_v46 = vrot.slane %v938_v50, 5 }
 0x23a   : > { %v1547_v12 = vpop.f32.mrf.mxu1  ;;  %v2812_v14 = vadd.f32 %v4352_v43, %v2726_v58  ;;  %3399 = vmatmul.msk.bf16.gmra.mxu2 %vm975_vm1, %v1768_v16  ;;  %v1775_v1 = vor.u32 %v1774_v46, %v1773_v55  ;;  %v946_v16 = vshll.u32 %v4646_v57, 16  ;;  %v950_v58 = vshrl.u32 %v4646_v57, 16 }
 0x23c   : > { %2894 = vst [vmem:[%s3958_s12 + $0x188] sm:$0xff] %v2812_v14 }
 0x23d   : > { %v2078_v19 = vpop.f32.mrf.mxu2  ;;  %v1239_v22 = vpop.f32.mrf.mxu0 }
 0x23e   : > { %v2208_v24 = vadd.f32 %v2078_v19, %v1546_v17  ;;  %v1548_v36 = vadd.f32 %v1547_v12, %v1239_v22  ;;  %v2318_v19 = vrot.slane %v4646_v57, 5 }
 0x240   : > { %v2599_v27 = vpop.f32.mrf.mxu3  ;;  %v2727_v30 = vadd.f32 %v2597_v13, %v2208_v24  ;;  %v2319_v29 = vsel %vm2244_vm2, %v2316_v52, %v2318_v19 }
 0x242   : > { %v1550_v25 = vpop.f32.mrf.mxu1  ;;  %v2813_v34 = vadd.f32 %v4352_v43, %v2727_v30  ;;  %v928_v30 = vor.u32 %v926_v54, %v924_v63 }
 0x244   : > { %2895 = vst [vmem:[%s3958_s12 + $0x190] sm:$0xff] %v2813_v34 }
 0x245   : > { %3352 = vmatmul.msk.bf16.gmra.mxu1 %vm975_vm1, %v4516_v59  ;;  %3448 = vmatmul.msk.bf16.gmra.mxu3 %vm975_vm1, %v2315_v31  ;;  %v2080_v37 = vpop.f32.mrf.mxu2  ;;  %v1242_v38 = vpop.f32.mrf.mxu0  ;;  %v1772_v59 = vsel %vm1629_vm4, %v1767_v6, %v1771_v35  ;;  %v932_v31 = vrot.slane %v930_v21, 1  ;;  %v4673_v21 = vld [vmem:[%s3828_s8 + $0x140] sm:$0xff]  ;;  %s4701_s8 = scalar_lea.vmem %s4855_s1, %s3089_s27  ;;  %s2928_s27 = scalar_lea.sflag [#allocation3], %s282_s26 }
 0x246   : > { %v2209_v39 = vadd.f32 %v2080_v37, %v1548_v36  ;;  %v1551_v47 = vadd.f32 %v1550_v25, %v1242_v38  ;;  %v1777_v25 = vrot.slane %v950_v58, 4 }
 0x247   : > { %v933_v37 = vsel %vm633_vm3, %v928_v30, %v932_v31 }
 0x248   : > { %v2602_v41 = vpop.f32.mrf.mxu3  ;;  %v2728_v56 = vadd.f32 %v2599_v27, %v2209_v39  ;;  %3307 = vmatmul.msk.bf16.gmra.mxu0 %vm975_vm1, %v917_v26  ;;  %v1778_v27 = vrot.slane %v946_v16, 5 }
 0x24a   : > { %v1552_v40 = vpop.f32.mrf.mxu1  ;;  %v2814_v42 = vadd.f32 %v4352_v43, %v2728_v56  ;;  %3400 = vmatmul.msk.bf16.gmra.mxu2 %vm975_vm1, %v1772_v59  ;;  %v1779_v33 = vor.u32 %v1778_v27, %v1777_v25  ;;  %v954_v59 = vshll.u32 %v4673_v21, 16  ;;  %v958_v56 = vshrl.u32 %v4673_v21, 16 }
 0x24c   : > { %2896 = vst [vmem:[%s3958_s12 + $0x198] sm:$0xff] %v2814_v42  ;;  %v1780_v26 = vsel %vm1629_vm4, %v1775_v1, %v1779_v33 }
 0x24d   : > { %v2083_v48 = vpop.f32.mrf.mxu2  ;;  %v1244_v51 = vpop.f32.mrf.mxu0 }
 0x24e   : > { %v2210_v44 = vadd.f32 %v2083_v48, %v1551_v47  ;;  %v1553_v5 = vadd.f32 %v1552_v40, %v1244_v51  ;;  %v2320_v48 = vrot.slane %v4673_v21, 5 }
 0x250   : > { %v2604_v53 = vpop.f32.mrf.mxu3  ;;  %v2729_v60 = vadd.f32 %v2602_v41, %v2210_v44  ;;  %v2321_v46 = vsel %vm2244_vm2, %v2318_v19, %v2320_v48 }
 0x252   : > { %v1555_v45 = vpop.f32.mrf.mxu1  ;;  %v2815_v0 = vadd.f32 %v4352_v43, %v2729_v60  ;;  %v936_v60 = vor.u32 %v934_v2, %v932_v31 }
 0x254   : > { %2897 = vst [vmem:[%s3958_s12 + $0x1a0] sm:$0xff] %v2815_v0 }
 0x255   : > { %3353 = vmatmul.msk.bf16.gmra.mxu1 %vm975_vm1, %v4542_v3  ;;  %3449 = vmatmul.msk.bf16.gmra.mxu3 %vm975_vm1, %v2317_v61  ;;  %v2085_v6 = vpop.f32.mrf.mxu2  ;;  %v1247_v7 = vpop.f32.mrf.mxu0  ;;  %v1776_v3 = vsel %vm1629_vm4, %v1771_v35, %v1775_v1  ;;  %v940_v61 = vrot.slane %v938_v50, 1 }
 0x256   : > { %v2211_v9 = vadd.f32 %v2085_v6, %v1553_v5  ;;  %v1556_v13 = vadd.f32 %v1555_v45, %v1247_v7  ;;  %v1781_v45 = vrot.slane %v958_v56, 4 }
 0x257   : > { %v941_v1 = vsel %vm633_vm3, %v936_v60, %v940_v61 }
 0x258   : > { %v2607_v11 = vpop.f32.mrf.mxu3  ;;  %v2730_v4 = vadd.f32 %v2604_v53, %v2211_v9  ;;  %3308 = vmatmul.msk.bf16.gmra.mxu0 %vm975_vm1, %v925_v8  ;;  %v1782_v53 = vrot.slane %v954_v59, 5  ;;  %v4706_v8 = vld [vmem:[%s4701_s8] sm:$0xff] }
 0x25a   : > { %v1557_v10 = vpop.f32.mrf.mxu1  ;;  %v2816_v12 = vadd.f32 %v4352_v43, %v2730_v4  ;;  %3401 = vmatmul.msk.bf16.gmra.mxu2 %vm975_vm1, %v1776_v3  ;;  %v1783_v63 = vor.u32 %v1782_v53, %v1781_v45  ;;  %v962_v3 = vshll.u32 %v4706_v8, 16  ;;  %v1785_v4 = vshrl.u32 %v4706_v8, 16 }
 0x25c   : > { %2898 = vst [vmem:[%s3958_s12 + $0x1a8] sm:$0xff] %v2816_v12  ;;  %v1784_v7 = vsel %vm1629_vm4, %v1779_v33, %v1783_v63 }
 0x25d   : > { %v2088_v14 = vpop.f32.mrf.mxu2  ;;  %v1249_v17 = vpop.f32.mrf.mxu0 }
 0x25e   : > { %v2212_v22 = vadd.f32 %v2088_v14, %v1556_v13  ;;  %v1558_v34 = vadd.f32 %v1557_v10, %v1249_v17  ;;  %v2322_v14 = vrot.slane %v4706_v8, 5 }
 0x260   : > { %v2609_v24 = vpop.f32.mrf.mxu3  ;;  %v2731_v28 = vadd.f32 %v2607_v11, %v2212_v22  ;;  %v2323_v27 = vsel %vm2244_vm2, %v2320_v48, %v2322_v14 }
 0x262   : > { %v1560_v23 = vpop.f32.mrf.mxu1  ;;  %v2817_v32 = vadd.f32 %v4352_v43, %v2731_v28  ;;  %v944_v28 = vor.u32 %v942_v18, %v940_v61  ;;  %v3506_v18 = vld [vmem:[%s4701_s8 + $0x8] sm:$0xff] }
 0x264   : > { %2899 = vst [vmem:[%s3958_s12 + $0x1b0] sm:$0xff] %v2817_v32 }
 0x265   : > { %3354 = vmatmul.msk.bf16.gmra.mxu1 %vm975_vm1, %v4568_v20  ;;  %3450 = vmatmul.msk.bf16.gmra.mxu3 %vm975_vm1, %v2319_v29  ;;  %v2090_v35 = vpop.f32.mrf.mxu2  ;;  %v1252_v36 = vpop.f32.mrf.mxu0  ;;  %v948_v29 = vrot.slane %v946_v16, 1 }
 0x266   : > { %v2213_v38 = vadd.f32 %v2090_v35, %v1558_v34  ;;  %v1561_v41 = vadd.f32 %v1560_v23, %v1252_v36  ;;  %v1787_v23 = vrot.slane %v1785_v4, 4 }
 0x267   : > { %v949_v35 = vsel %vm633_vm3, %v944_v28, %v948_v29  ;;  %v952_v53 = vor.u32 %v950_v58, %v948_v29 }
 0x268   : > { %v2612_v54 = vpop.f32.mrf.mxu3  ;;  %v2732_v39 = vadd.f32 %v2609_v24, %v2213_v38  ;;  %3309 = vmatmul.msk.bf16.gmra.mxu0 %vm975_vm1, %v933_v37  ;;  %v1788_v24 = vrot.slane %v962_v3, 5 }
 0x26a   : > { %v1562_v20 = vpop.f32.mrf.mxu1  ;;  %v2818_v40 = vadd.f32 %v4352_v43, %v2732_v39  ;;  %3402 = vmatmul.msk.bf16.gmra.mxu2 %vm975_vm1, %v1780_v26  ;;  %v1789_v31 = vor.u32 %v1788_v24, %v1787_v23  ;;  %v1792_v26 = vshrl.u32 %v3506_v18, 16  ;;  %v1795_v39 = vshll.u32 %v3506_v18, 16 }
 0x26c   : > { %2900 = vst [vmem:[%s3958_s12 + $0x1b8] sm:$0xff] %v2818_v40 }
 0x26d   : > { %v2093_v42 = vpop.f32.mrf.mxu2  ;;  %v1254_v47 = vpop.f32.mrf.mxu0 }
 0x26e   : > { %v2214_v51 = vadd.f32 %v2093_v42, %v1561_v41  ;;  %v1563_v0 = vadd.f32 %v1562_v20, %v1254_v47  ;;  %v2324_v42 = vrot.slane %v3506_v18, 5 }
 0x270   : > { %v2614_v44 = vpop.f32.mrf.mxu3  ;;  %v2733_v55 = vadd.f32 %v2612_v54, %v2214_v51 }
 0x272   : > { %v1565_v52 = vpop.f32.mrf.mxu1  ;;  %v2819_v62 = vadd.f32 %v4352_v43, %v2733_v55  ;;  %v956_v55 = vrot.slane %v954_v59, 1 }
 0x274   : > { %2901 = vst [vmem:[%s3958_s12 + $0x1c0] sm:$0xff] %v2819_v62  ;;  %v957_v58 = vsel %vm633_vm3, %v952_v53, %v956_v55  ;;  %v960_v24 = vor.u32 %v958_v56, %v956_v55 }
 0x275   : > { %3355 = vmatmul.msk.bf16.gmra.mxu1 %vm975_vm1, %v4594_v49  ;;  %3451 = vmatmul.msk.bf16.gmra.mxu3 %vm975_vm1, %v2321_v46  ;;  %v2095_v49 = vpop.f32.mrf.mxu2  ;;  %v1257_v2 = vpop.f32.mrf.mxu0  ;;  %v4744_v46 = vld [vmem:[%s4857_s3] ss:$0 sm:$0xff] }
 0x276   : > { %v2215_v50 = vadd.f32 %v2095_v49, %v1563_v0  ;;  %v1566_v11 = vadd.f32 %v1565_v52, %v1257_v2  ;;  %v1794_v52 = vrot.slane %v1792_v26, 4 }
 0x278   : > { %v2617_v6 = vpop.f32.mrf.mxu3  ;;  %v2734_v9 = vadd.f32 %v2614_v44, %v2215_v50  ;;  %3310 = vmatmul.msk.bf16.gmra.mxu0 %vm975_vm1, %v941_v1  ;;  %v1797_v44 = vrot.slane %v1795_v39, 5  ;;  %v3507_v1 = vld [vmem:[%s4701_s8 + $0x10] sm:$0xff] }
 0x279   : > { %v2326_v4 = vrot.slane %v3507_v1, 5 }
 0x27a   : > { %v1567_v5 = vpop.f32.mrf.mxu1  ;;  %v2820_v10 = vadd.f32 %v4352_v43, %v2734_v9  ;;  %3403 = vmatmul.msk.bf16.gmra.mxu2 %vm975_vm1, %v1784_v7  ;;  %v1798_v61 = vor.u32 %v1797_v44, %v1794_v52  ;;  %v1801_v7 = vshrl.u32 %v3507_v1, 16  ;;  %v1804_v9 = vshll.u32 %v3507_v1, 16 }
 0x27b   : > { %v2327_v23 = vsel %vm2244_vm2, %v2324_v42, %v2326_v4 }
 0x27c   : > { %2902 = vst [vmem:[%s3958_s12 + $0x1c8] sm:$0xff] %v2820_v10  ;;  %v1799_v2 = vsel %vm1629_vm4, %v1789_v31, %v1798_v61 }
 0x27d   : > { %v2098_v12 = vpop.f32.mrf.mxu2  ;;  %v1259_v13 = vpop.f32.mrf.mxu0 }
 0x27e   : > { %v2216_v17 = vadd.f32 %v2098_v12, %v1566_v11  ;;  %v1568_v32 = vadd.f32 %v1567_v5, %v1259_v13 }
 0x280   : > { %v2619_v22 = vpop.f32.mrf.mxu3  ;;  %v2735_v25 = vadd.f32 %v2617_v6, %v2216_v17  ;;  %v1803_v17 = vrot.slane %v1801_v7, 4 }
 0x282   : > { %v1570_v19 = vpop.f32.mrf.mxu1  ;;  %v2821_v30 = vadd.f32 %v4352_v43, %v2735_v25  ;;  %v964_v25 = vrot.slane %v962_v3, 1 }
 0x284   : > { %2903 = vst [vmem:[%s3958_s12 + $0x1d0] sm:$0xff] %v2821_v30 }
 0x285   : > { %3356 = vmatmul.msk.bf16.gmra.mxu1 %vm975_vm1, %v4620_v15  ;;  %3452 = vmatmul.msk.bf16.gmra.mxu3 %vm975_vm1, %v2323_v27  ;;  %v2100_v33 = vpop.f32.mrf.mxu2  ;;  %v1262_v34 = vpop.f32.mrf.mxu0  ;;  %v1790_v15 = vsel %vm1629_vm4, %v1783_v63, %v1789_v31 }
 0x286   : > { %v2217_v36 = vadd.f32 %v2100_v33, %v1568_v32  ;;  %v1571_v54 = vadd.f32 %v1570_v19, %v1262_v34  ;;  %v1806_v19 = vrot.slane %v1804_v9, 5  ;;  %v965_v32 = vsel %vm633_vm3, %v960_v24, %v964_v25 }
 0x288   : > { %v2622_v38 = vpop.f32.mrf.mxu3  ;;  %v2736_v20 = vadd.f32 %v2619_v22, %v2217_v36  ;;  %3311 = vmatmul.msk.bf16.gmra.mxu0 %vm975_vm1, %v949_v35  ;;  %v1807_v28 = vor.u32 %v1806_v19, %v1803_v17 }
 0x28a   : > { %v1572_v37 = vpop.f32.mrf.mxu1  ;;  %v2822_v16 = vadd.f32 %v4352_v43, %v2736_v20  ;;  %3404 = vmatmul.msk.bf16.gmra.mxu2 %vm975_vm1, %v1790_v15  ;;  %v2325_v43 = vsel %vm2244_vm2, %v2322_v14, %v2324_v42  ;;  %v1808_v56 = vsel %vm1629_vm4, %v1798_v61, %v1807_v28 }
 0x28c   : > { %2904 = vst [vmem:[%s3958_s12 + $0x1d8] sm:$0xff] %v2822_v16 }
 0x28d   : > { %v2103_v40 = vpop.f32.mrf.mxu2  ;;  %v1264_v41 = vpop.f32.mrf.mxu0 }
 0x28e   : > { %v2218_v47 = vadd.f32 %v2103_v40, %v1571_v54  ;;  %v1573_v62 = vadd.f32 %v1572_v37, %v1264_v41 }
 0x290   : > { %v2624_v51 = vpop.f32.mrf.mxu3  ;;  %v2737_v45 = vadd.f32 %v2622_v38, %v2218_v47 }
 0x292   : > { %v1575_v48 = vpop.f32.mrf.mxu1  ;;  %v2823_v60 = vadd.f32 %v4744_v46, %v2737_v45 }
 0x294   : > { %2905 = vst [vmem:[%s3958_s12 + $0x1e0] sm:$0xff] %v2823_v60 }
 0x295   : > { %3357 = vmatmul.msk.bf16.gmra.mxu1 %vm975_vm1, %v4646_v57  ;;  %3453 = vmatmul.msk.bf16.gmra.mxu3 %vm975_vm1, %v2325_v43  ;;  %v2105_v63 = vpop.f32.mrf.mxu2  ;;  %v1267_v57 = vpop.f32.mrf.mxu0 }
 0x296   : > { %v2219_v0 = vadd.f32 %v2105_v63, %v1573_v62  ;;  %v1576_v6 = vadd.f32 %v1575_v48, %v1267_v57 }
 0x298   : > { %v2627_v59 = vpop.f32.mrf.mxu3  ;;  %v2738_v50 = vadd.f32 %v2624_v51, %v2219_v0  ;;  %3312 = vmatmul.msk.bf16.gmra.mxu0 %vm975_vm1, %v957_v58 }
 0x29a   : > { %v1577_v49 = vpop.f32.mrf.mxu1  ;;  %v2824_v5 = vadd.f32 %v4744_v46, %v2738_v50  ;;  %3405 = vmatmul.msk.bf16.gmra.mxu2 %vm975_vm1, %v1799_v2 }
 0x29c   : > { %2906 = vst [vmem:[%s3958_s12 + $0x1e8] sm:$0xff] %v2824_v5 }
 0x29d   : > { %v2108_v10 = vpop.f32.mrf.mxu2  ;;  %v1269_v11 = vpop.f32.mrf.mxu0 }
 0x29e   : > { %v2220_v12 = vadd.f32 %v2108_v10, %v1576_v6  ;;  %v1578_v29 = vadd.f32 %v1577_v49, %v1269_v11 }
 0x2a0   : > { %v2629_v14 = vpop.f32.mrf.mxu3  ;;  %v2739_v22 = vadd.f32 %v2627_v59, %v2220_v12 }
 0x2a2   : > { %v1580_v13 = vpop.f32.mrf.mxu1  ;;  %v2825_v27 = vadd.f32 %v4744_v46, %v2739_v22 }
 0x2a4   : > { %2907 = vst [vmem:[%s3958_s12 + $0x1f0] sm:$0xff] %v2825_v27 }
 0x2a5   : > { %3358 = vmatmul.msk.bf16.gmra.mxu1 %vm975_vm1, %v4673_v21  ;;  %3454 = vmatmul.msk.bf16.gmra.mxu3 %vm975_vm1, %v2327_v23  ;;  %v2110_v30 = vpop.f32.mrf.mxu2  ;;  %v1272_v31 = vpop.f32.mrf.mxu0 }
 0x2a6   : > { %v2221_v33 = vadd.f32 %v2110_v30, %v1578_v29  ;;  %v1581_v35 = vadd.f32 %v1580_v13, %v1272_v31 }
 0x2a8   : > { %v2632_v21 = vpop.f32.mrf.mxu3  ;;  %v2740_v8 = vadd.f32 %v2629_v14, %v2221_v33  ;;  %3313 = vmatmul.msk.bf16.gmra.mxu0 %vm975_vm1, %v965_v32 }
 0x2aa   : > { %v1582_v34 = vpop.f32.mrf.mxu1  ;;  %v2826_v3 = vadd.f32 %v4744_v46, %v2740_v8  ;;  %3406 = vmatmul.msk.bf16.gmra.mxu2 %vm975_vm1, %v1808_v56 }
 0x2ac   : > { %2908 = vst [vmem:[%s3958_s12 + $0x1f8] sm:$0xff] %v2826_v3 }
 0x2ad   : > { %v2113_v36 = vpop.f32.mrf.mxu2  ;;  %v1274_v37 = vpop.f32.mrf.mxu0 }
 0x2ae   : > { %v2222_v38 = vadd.f32 %v2113_v36, %v1581_v35  ;;  %v1583_v54 = vadd.f32 %v1582_v34, %v1274_v37 }
 0x2b0   : > { %v2634_v18 = vpop.f32.mrf.mxu3  ;;  %v2741_v20 = vadd.f32 %v2632_v21, %v2222_v38 }
 0x2b2   : > { %v1585_v15 = vpop.f32.mrf.mxu1  ;;  %v2827_v16 = vadd.f32 %v4744_v46, %v2741_v20 }
 0x2b4   : > { %2909 = vst [vmem:[%s3958_s12 + $0x200] sm:$0xff] %v2827_v16 }
 0x2b5   : > { %v2115_v26 = vpop.f32.mrf.mxu2  ;;  %v1277_v39 = vpop.f32.mrf.mxu0 }
 0x2b6   : > { %v2223_v40 = vadd.f32 %v2115_v26, %v1583_v54  ;;  %v1586_v51 = vadd.f32 %v1585_v15, %v1277_v39 }
 0x2b8   : > { %v2637_v42 = vpop.f32.mrf.mxu3  ;;  %v2742_v47 = vadd.f32 %v2634_v18, %v2223_v40 }
 0x2ba   : > { %v1587_v41 = vpop.f32.mrf.mxu1  ;;  %v2828_v48 = vadd.f32 %v4744_v46, %v2742_v47 }
 0x2bc   : > { %2910 = vst [vmem:[%s3958_s12 + $0x208] sm:$0xff] %v2828_v48 }
 0x2bd   : > { %v2118_v52 = vpop.f32.mrf.mxu2  ;;  %v1279_v44 = vpop.f32.mrf.mxu0 }
 0x2be   : > { %v2224_v45 = vadd.f32 %v2118_v52, %v1586_v51  ;;  %v1588_v61 = vadd.f32 %v1587_v41, %v1279_v44 }
 0x2c0   : > { %v2639_v53 = vpop.f32.mrf.mxu3  ;;  %v2743_v55 = vadd.f32 %v2637_v42, %v2224_v45 }
 0x2c2   : > { %v1590_v43 = vpop.f32.mrf.mxu1  ;;  %v2829_v60 = vadd.f32 %v4744_v46, %v2743_v55 }
 0x2c4   : > { %2911 = vst [vmem:[%s3958_s12 + $0x210] sm:$0xff] %v2829_v60 }
 0x2c5   : > { %v2120_v62 = vpop.f32.mrf.mxu2  ;;  %v1282_v63 = vpop.f32.mrf.mxu0 }
 0x2c6   : > { %v2225_v57 = vadd.f32 %v2120_v62, %v1588_v61  ;;  %v1591_v2 = vadd.f32 %v1590_v43, %v1282_v63 }
 0x2c8   : > { %v2642_v0 = vpop.f32.mrf.mxu3  ;;  %v2744_v49 = vadd.f32 %v2639_v53, %v2225_v57 }
 0x2ca   : > { %v1592_v58 = vpop.f32.mrf.mxu1  ;;  %v2830_v59 = vadd.f32 %v4744_v46, %v2744_v49 }
 0x2cc   : > { %2912 = vst [vmem:[%s3958_s12 + $0x218] sm:$0xff] %v2830_v59 }
 0x2cd   : > { %v2123_v1 = vpop.f32.mrf.mxu2  ;;  %v1284_v50 = vpop.f32.mrf.mxu0 }
 0x2ce   : > { %v2226_v5 = vadd.f32 %v2123_v1, %v1591_v2  ;;  %v1593_v11 = vadd.f32 %v1592_v58, %v1284_v50 }
 0x2d0   : > { %v2644_v7 = vpop.f32.mrf.mxu3  ;;  %v2745_v9 = vadd.f32 %v2642_v0, %v2226_v5 }
 0x2d2   : > { %v1595_v6 = vpop.f32.mrf.mxu1  ;;  %v2831_v10 = vadd.f32 %v4744_v46, %v2745_v9 }
 0x2d4   : > { %2913 = vst [vmem:[%s3958_s12 + $0x220] sm:$0xff] %v2831_v10 }
 0x2d5   : > { %v2125_v4 = vpop.f32.mrf.mxu2  ;;  %v1287_v12 = vpop.f32.mrf.mxu0 }
 0x2d6   : > { %v2227_v13 = vadd.f32 %v2125_v4, %v1593_v11  ;;  %v1596_v23 = vadd.f32 %v1595_v6, %v1287_v12 }
 0x2d8   : > { %v2647_v17 = vpop.f32.mrf.mxu3  ;;  %v2746_v19 = vadd.f32 %v2644_v7, %v2227_v13 }
 0x2da   : > { %v1597_v14 = vpop.f32.mrf.mxu1  ;;  %v2832_v22 = vadd.f32 %v4744_v46, %v2746_v19 }
 0x2dc   : > { %2914 = vst [vmem:[%s3958_s12 + $0x228] sm:$0xff] %v2832_v22 }
 0x2dd   : > { %v2128_v24 = vpop.f32.mrf.mxu2  ;;  %v1289_v25 = vpop.f32.mrf.mxu0 }
 0x2de   : > { %v2228_v27 = vadd.f32 %v2128_v24, %v1596_v23  ;;  %v1598_v32 = vadd.f32 %v1597_v14, %v1289_v25 }
 0x2e0   : > { %v2649_v29 = vpop.f32.mrf.mxu3  ;;  %v2747_v30 = vadd.f32 %v2647_v17, %v2228_v27 }
 0x2e2   : > { %v1600_v28 = vpop.f32.mrf.mxu1  ;;  %v2833_v31 = vadd.f32 %v4744_v46, %v2747_v30 }
 0x2e4   : > { %2915 = vst [vmem:[%s3958_s12 + $0x230] sm:$0xff] %v2833_v31 }
 0x2e5   : > { %v2130_v33 = vpop.f32.mrf.mxu2  ;;  %v1292_v34 = vpop.f32.mrf.mxu0 }
 0x2e6   : > { %v2229_v21 = vadd.f32 %v2130_v33, %v1598_v32  ;;  %v1601_v36 = vadd.f32 %v1600_v28, %v1292_v34 }
 0x2e8   : > { %v2652_v8 = vpop.f32.mrf.mxu3  ;;  %v2748_v3 = vadd.f32 %v2649_v29, %v2229_v21 }
 0x2ea   : > { %v1602_v56 = vpop.f32.mrf.mxu1  ;;  %v2834_v35 = vadd.f32 %v4744_v46, %v2748_v3 }
 0x2ec   : > { %2916 = vst [vmem:[%s3958_s12 + $0x238] sm:$0xff] %v2834_v35 }
 0x2ed   : > { %v2133_v37 = vpop.f32.mrf.mxu2  ;;  %v1294_v38 = vpop.f32.mrf.mxu0 }
 0x2ee   : > { %v2230_v15 = vadd.f32 %v2133_v37, %v1601_v36  ;;  %v1603_v26 = vadd.f32 %v1602_v56, %v1294_v38 }
 0x2f0   : > { %v2654_v20 = vpop.f32.mrf.mxu3  ;;  %v2749_v16 = vadd.f32 %v2652_v8, %v2230_v15 }
 0x2f2   : > { %v1605_v18 = vpop.f32.mrf.mxu1  ;;  %v2835_v54 = vadd.f32 %v4744_v46, %v2749_v16 }
 0x2f4   : > { %2917 = vst [vmem:[%s3958_s12 + $0x240] sm:$0xff] %v2835_v54 }
 0x2f5   : > { %v2135_v39 = vpop.f32.mrf.mxu2  ;;  %v1297_v40 = vpop.f32.mrf.mxu0 }
 0x2f6   : > { %v2231_v41 = vadd.f32 %v2135_v39, %v1603_v26  ;;  %v1606_v52 = vadd.f32 %v1605_v18, %v1297_v40 }
 0x2f8   : > { %v2657_v47 = vpop.f32.mrf.mxu3  ;;  %v2750_v48 = vadd.f32 %v2654_v20, %v2231_v41 }
 0x2fa   : > { %v1607_v42 = vpop.f32.mrf.mxu1  ;;  %v2836_v51 = vadd.f32 %v4744_v46, %v2750_v48 }
 0x2fc   : > { %2918 = vst [vmem:[%s3958_s12 + $0x248] sm:$0xff] %v2836_v51 }
 0x2fd   : > { %v2138_v44 = vpop.f32.mrf.mxu2  ;;  %v1299_v45 = vpop.f32.mrf.mxu0 }
 0x2fe   : > { %v2232_v43 = vadd.f32 %v2138_v44, %v1606_v52  ;;  %v1608_v62 = vadd.f32 %v1607_v42, %v1299_v45 }
 0x300   : > { %v2659_v53 = vpop.f32.mrf.mxu3  ;;  %v2751_v55 = vadd.f32 %v2657_v47, %v2232_v43 }
 0x302   : > { %v1610_v60 = vpop.f32.mrf.mxu1  ;;  %v2837_v61 = vadd.f32 %v4744_v46, %v2751_v55 }
 0x304   : > { %2919 = vst [vmem:[%s3958_s12 + $0x250] sm:$0xff] %v2837_v61 }
 0x305   : > { %v2140_v63 = vpop.f32.mrf.mxu2  ;;  %v1302_v57 = vpop.f32.mrf.mxu0 }
 0x306   : > { %v2233_v58 = vadd.f32 %v2140_v63, %v1608_v62  ;;  %v1611_v2 = vadd.f32 %v1610_v60, %v1302_v57 }
 0x308   : > { %v2662_v0 = vpop.f32.mrf.mxu3  ;;  %v2752_v49 = vadd.f32 %v2659_v53, %v2233_v58 }
 0x30a   : > { %v2838_v59 = vadd.f32 %v4744_v46, %v2752_v49  ;;  %v1612_v1 = vpop.f32.mrf.mxu1 }
 0x30c   : > { %2920 = vst [vmem:[%s3958_s12 + $0x258] sm:$0xff] %v2838_v59 }
 0x30d   : > { %v2143_v50 = vpop.f32.mrf.mxu2  ;;  %v1304_v5 = vpop.f32.mrf.mxu0 }
 0x30e   : > { %v2234_v6 = vadd.f32 %v2143_v50, %v1611_v2  ;;  %v1613_v11 = vadd.f32 %v1612_v1, %v1304_v5 }
 0x310   : > { %v2664_v7 = vpop.f32.mrf.mxu3  ;;  %v2753_v9 = vadd.f32 %v2662_v0, %v2234_v6 }
 0x312   : > { %v2839_v10 = vadd.f32 %v4744_v46, %v2753_v9  ;;  %v1615_v4 = vpop.f32.mrf.mxu1 }
 0x314   : > { %2921 = vst [vmem:[%s3958_s12 + $0x260] sm:$0xff] %v2839_v10 }
 0x315   : > { %v2145_v12 = vpop.f32.mrf.mxu2  ;;  %v1307_v13 = vpop.f32.mrf.mxu0 }
 0x316   : > { %v2235_v14 = vadd.f32 %v2145_v12, %v1613_v11  ;;  %v1616_v23 = vadd.f32 %v1615_v4, %v1307_v13 }
 0x318   : > { %v2754_v17 = vadd.f32 %v2664_v7, %v2235_v14  ;;  %v2667_v19 = vpop.f32.mrf.mxu3 }
 0x31a   : > { %v2840_v22 = vadd.f32 %v4744_v46, %v2754_v17  ;;  %v1617_v28 = vpop.f32.mrf.mxu1 }
 0x31c   : > { %2922 = vst [vmem:[%s3958_s12 + $0x268] sm:$0xff] %v2840_v22 }
 0x31d   : > { %v2148_v24 = vpop.f32.mrf.mxu2  ;;  %v1309_v25 = vpop.f32.mrf.mxu0 }
 0x31e   : > { %v2236_v27 = vadd.f32 %v2148_v24, %v1616_v23  ;;  %v1618_v32 = vadd.f32 %v1617_v28, %v1309_v25 }
 0x320   : > { %v2755_v29 = vadd.f32 %v2667_v19, %v2236_v27  ;;  %v2669_v31 = vpop.f32.mrf.mxu3 }
 0x322   : > { %v2841_v30 = vadd.f32 %v4744_v46, %v2755_v29  ;;  %v1620_v8 = vpop.f32.mrf.mxu1 }
 0x324   : > { %2923 = vst [vmem:[%s3958_s12 + $0x270] sm:$0xff] %v2841_v30 }
 0x325   : > { %v2150_v33 = vpop.f32.mrf.mxu2  ;;  %v1312_v21 = vpop.f32.mrf.mxu0 }
 0x326   : > { %v2237_v34 = vadd.f32 %v2150_v33, %v1618_v32  ;;  %v1621_v35 = vadd.f32 %v1620_v8, %v1312_v21 }
 0x328   : > { %v2756_v56 = vadd.f32 %v2669_v31, %v2237_v34  ;;  %v2672_v36 = vpop.f32.mrf.mxu3 }
 0x32a   : > { %v2842_v3 = vadd.f32 %v4744_v46, %v2756_v56  ;;  %v1622_v16 = vpop.f32.mrf.mxu1 }
 0x32c   : > { %2924 = vst [vmem:[%s3958_s12 + $0x278] sm:$0xff] %v2842_v3 }
 0x32d   : > { %v2153_v37 = vpop.f32.mrf.mxu2  ;;  %v1314_v18 = vpop.f32.mrf.mxu0 }
 0x32e   : > { %v2238_v38 = vadd.f32 %v2153_v37, %v1621_v35  ;;  %v1623_v54 = vadd.f32 %v1622_v16, %v1314_v18 }
 0x330   : > { %v2757_v15 = vadd.f32 %v2672_v36, %v2238_v38  ;;  %v2674_v40 = vpop.f32.mrf.mxu3 }
 0x332   : > { %v2843_v20 = vadd.f32 %v4744_v46, %v2757_v15 }
 0x334   : > { %2925 = vst [vmem:[%s3958_s12 + $0x280] sm:$0xff] %v2843_v20 }
 0x335   : > { %v2155_v26 = vpop.f32.mrf.mxu2 }
 0x336   : > { %v2239_v39 = vadd.f32 %v2155_v26, %v1623_v54 }
 0x338   : > { %v2758_v41 = vadd.f32 %v2674_v40, %v2239_v39 }
 0x33a   : > { %v2844_v42 = vadd.f32 %v4744_v46, %v2758_v41 }
 0x33c   : > { %2926 = vst [vmem:[%s3958_s12 + $0x288] sm:$0xff] %v2844_v42 }
 0x33d   : > { %3618 = shalt.err (!%p3615_p9)
}
 0x33e   : > { %s3687_s26 = smov 128   ;;  %s3688_s12 = smov 8  }
 0x33f   : > { %3515 = dma.vmem_to_hbm [thread:$0]  (%p3765_p3), %s2944_s18, 10496, %s2946_s24, %s2928_s27, %s3687_s26, %s3687_s26, %s3688_s12  }
 0x340 PF: > { %p3521_p10 = scmp.ge.s32.totalorder %s3685_s22, 2  ;;  %s2960_s14 = sand.u32 1, %s3657_s15  }
 0x341   : > { %s2961_s23 = scalar_lea.sflag [#allocation3], %s2960_s14 }
 0x342   : > { %p3518_p11 = pnand %p3521_p10, %p3774_p8 }
 0x344   : > { %p3519_p12 = pneg %p3518_p11 }
 0x346   : > { %3652 = dma.done.wait (%p3519_p12), %s2961_s23, 10496  }
 0x347   : > { %3654 = vsyncadd (%p3519_p12), %s2961_s23, 4294956800  ;;  %s17_s22 = sadd.s32 1, %s3685_s22   ;;  %s4863_s28 = sld [smem:[#allocation5_spill]] }
 0x348   : > { %p14_p13 = scmp.ge.s32.totalorder %s17_s22, 8   ;;  %s4864_s15 = smov %s3661_s16 }
 0x349   : > { %s4865_s16 = smov %s3665_s17  ;;  %s4866_s17 = smov %s3783_s7 }
 0x34a   : > { %s4867_s18 = smov %s3677_s20  ;;  %s4868_s19 = smov %s3681_s21 }
 0x34b   : > { %s4869_s20 = smov %s4872_s25  ;;  %16 = sbr.rel (!%p14_p13) target bundleno = 5 (0x5), region = 83 }
 0x34d   : > { %s4870_s21 = smov %s4863_s28 }
 0x350   :  { %2967 = vsyncpa [#allocation3], 1 }
 0x351   :  { %2969 = vsyncpa [#allocation3 + $0x1], 1 }

</bundles_post_ra>
